<compile_context>
chip_gen: v7x
topology: tpu7x:2x2x1
jax: 0.10.0
libtpu: 0.0.40
codegen_flags: <defaults>
</compile_context>

<pallas_src>
import numpy as np
import jax
import jax.numpy as jnp
from jax.experimental import pallas as pl
from jax.experimental.pallas import tpu as pltpu


# ---------------------------------------------------------------------------
# MXU path: out = x_flat @ M, with M the replicate-clamped conv matrix.
# ---------------------------------------------------------------------------
def _mxu_kernel(m_ref, x_ref, o_ref):
    x = x_ref[...].astype(jnp.float32)
    o_ref[...] = jnp.dot(
        x, m_ref[...],
        preferred_element_type=jnp.float32,
        precision=jax.lax.Precision.HIGHEST,   # fp32 contract precision on MXU
    ).astype(o_ref.dtype)


def _build_conv_matrix(filt, H, W):
    """(HW, HW) matrix M s.t. x_flat @ M == depthwise_conv(replicate_pad(x))."""
    Kh, Kw = filt.shape
    ph_lo = (Kh - 1) // 2   # replicate-pad split: low side gets (K-1)//2
    pw_lo = (Kw - 1) // 2
    # TODO(synk): if the caller's pre_filter_func uses a different even-kernel
    # padding split, adjust ph_lo / pw_lo here and in the tap path.
    HW = H * W
    ys, xs = np.meshgrid(np.arange(H), np.arange(W), indexing="ij")
    dst = (ys * W + xs).reshape(-1)
    f32 = jnp.asarray(filt, jnp.float32)
    M = jnp.zeros((HW, HW), jnp.float32)
    for dh in range(Kh):
        for dw in range(Kw):
            sy = np.clip(ys + dh - ph_lo, 0, H - 1)
            sx = np.clip(xs + dw - pw_lo, 0, W - 1)
            src = (sy * W + sx).reshape(-1)
            M = M.at[src, dst].add(f32[dh, dw])
    return M


# ---------------------------------------------------------------------------
# Tap (VPU/XLU) path: in-register replicate padding via clamped lane rolls.
# ---------------------------------------------------------------------------
def _make_tap_kernel(Kh, Kw, H, W, HW, separable):
    ph_lo = (Kh - 1) // 2
    pw_lo = (Kw - 1) // 2
    w_pow2 = (W & (W - 1)) == 0

    def kernel(f_ref, x_ref, o_ref):
        x = x_ref[...].astype(jnp.float32)                 # (blk, H*W) slab
        shape = x.shape

        # boundary masks, computed once per grid step
        lane = jax.lax.broadcasted_iota(jnp.int32, shape, 1)
        col = (lane & (W - 1)) if w_pow2 else (lane % W)
        first_col = col == 0
        last_col = col == (W - 1)
        first_row = lane < W
        last_row = lane >= (H - 1) * W

        def shift(a, delta):
            # result[..., l] = a[..., l + delta]; wrapped lanes are always
            # overwritten by the boundary selects below (replicate clamp).
            k = (-delta) % HW
            return pltpu.roll(a, k, 1) if k else a

        row_dn = lambda a: jnp.where(last_row, a, shift(a, W))    # y -> min(y+1, H-1)
        row_up = lambda a: jnp.where(first_row, a, shift(a, -W))  # y -> max(y-1, 0)
        col_rt = lambda a: jnp.where(last_col, a, shift(a, 1))    # x -> min(x+1, W-1)
        col_lt = lambda a: jnp.where(first_col, a, shift(a, -1))  # x -> max(x-1, 0)

        def reduce_taps(base, weights, lo, step_pos, step_neg):
            """sum_d weights[d] * clamped_shift(base, d - lo), 2 accumulators."""
            n = len(weights)
            acc = [weights[lo] * base, jnp.zeros(shape, jnp.float32)]
            slot = 1
            cur = base
            for d in range(lo + 1, n):            # positive offsets
                cur = step_pos(cur)
                acc[slot] = acc[slot] + weights[d] * cur
                slot ^= 1
            cur = base
            for d in range(lo - 1, -1, -1):       # negative offsets
                cur = step_neg(cur)
                acc[slot] = acc[slot] + weights[d] * cur
                slot ^= 1
            return acc[0] + acc[1]

        if separable:
            # rank-1 filter: column pass (Kw taps) then row pass (Kh taps)
            fr = [f_ref[i] for i in range(Kh)]
            fc = [f_ref[Kh + j] for j in range(Kw)]
            t = reduce_taps(x, fc, pw_lo, col_rt, col_lt)
            out = reduce_taps(t, fr, ph_lo, row_dn, row_up)
        else:
            fv = [f_ref[i] for i in range(Kh * Kw)]
            acc = [jnp.zeros(shape, jnp.float32), jnp.zeros(shape, jnp.float32)]
            slot = 0

            def mac(w, v):
                nonlocal slot
                acc[slot] = acc[slot] + w * v
                slot ^= 1

            def row_taps(base, kh):
                mac(fv[kh * Kw + pw_lo], base)                   # dw = 0
                cur = base
                for dw in range(1, Kw - pw_lo):                  # dw = +1, +2, ...
                    cur = col_rt(cur)
                    mac(fv[kh * Kw + pw_lo + dw], cur)
                cur = base
                for dw in range(1, pw_lo + 1):                   # dw = -1, -2, ...
                    cur = col_lt(cur)
                    mac(fv[kh * Kw + pw_lo - dw], cur)

            row_taps(x, ph_lo)                                   # dh = 0
            cur = x
            for dh in range(1, Kh - ph_lo):                      # dh = +1, +2, ...
                cur = row_dn(cur)
                row_taps(cur, ph_lo + dh)
            cur = x
            for dh in range(1, ph_lo + 1):                       # dh = -1, -2, ...
                cur = row_up(cur)
                row_taps(cur, ph_lo - dh)
            out = acc[0] + acc[1]

        o_ref[...] = out.astype(o_ref.dtype)

    return kernel


def _try_separate(filt):
    """Return (fr, fc) with outer(fr, fc) == filt if the filter is rank-1."""
    try:
        f = np.asarray(filt, dtype=np.float64)     # fails for traced filters
    except Exception:
        return None
    if f.ndim != 2:
        return None
    u, s, vt = np.linalg.svd(f)
    if s.size == 0 or s[0] == 0.0:
        return None
    if s.size > 1 and s[1] > 1e-6 * s[0]:
        return None
    fr = (u[:, 0] * np.sqrt(s[0])).astype(np.float32)
    fc = (vt[0, :] * np.sqrt(s[0])).astype(np.float32)
    if np.max(np.abs(np.outer(fr, fc) - f)) > 1e-6 * max(float(np.max(np.abs(f))), 1e-30):
        return None
    return fr, fc


# ---------------------------------------------------------------------------
# Generation-aware tiling helpers.
# ---------------------------------------------------------------------------
def _tpu_vmem_capacity_bytes():
    try:
        return int(pltpu.get_tpu_info().vmem_capacity_bytes)
    except Exception:
        return 0


def _pick_bc_block(bc, hw, itemsize, slab_bytes):
    rows = max(1, slab_bytes // max(1, hw * itemsize))
    if bc >= 32:
        rows = min(rows, max(8, bc // 4))      # >= 4 grid steps: feed both v7x TCs
    elif bc >= 16:
        rows = min(rows, max(8, bc // 2))      # >= 2 grid steps for 16 <= BC < 32
    if rows >= bc:
        return bc                              # full axis -> always a legal block dim
    return max(8, (rows // 8) * 8)             # second-to-last dim must be 8-aligned


_MXU_MAX_HW = 1024   # resident (HW, HW) f32 conv matrix <= 4 MiB of VMEM


# ---------------------------------------------------------------------------
# Public wrapper: Filter_Layer.forward
# ---------------------------------------------------------------------------
def filter_layer_forward(x, filt, *, use_mxu=None):
    """Filter_Layer.forward: identity(Conv2d_depthwise(replicate_pad(x)))."""
    B, C, H, W = x.shape
    Kh, Kw = filt.shape
    BC, HW = B * C, H * W

    vmem_cap = _tpu_vmem_capacity_bytes()
    big_vmem = vmem_cap >= 96 * 1024 * 1024          # v5e/v6e (128 MiB); v7x = 64 MiB
    vmem_limit = (64 if big_vmem else 32) * 1024 * 1024
    # v5e/v6e (HBM-bound) amortize per-step overhead with ~2 MiB slabs; v7x
    # keeps ~1 MiB slabs so f32 temporaries + double-buffered I/O fit 64 MiB.
    slab_bytes = (2 << 20) if big_vmem else (1 << 20)

    if use_mxu is None:
        use_mxu = HW <= _MXU_MAX_HW

    x2 = x.reshape(BC, HW)                           # free, row-major reshape

    if use_mxu:
        m = _build_conv_matrix(filt, H, W)
        bc_block = _pick_bc_block(BC, HW, 4, slab_bytes)   # budget f32 slabs
        grid = (pl.cdiv(BC, bc_block),)
        out2 = pl.pallas_call(
            _mxu_kernel,
            out_shape=jax.ShapeDtypeStruct((BC, HW), x.dtype),
            grid_spec=pltpu.PrefetchScalarGridSpec(
                num_scalar_prefetch=0,
                grid=grid,
                in_specs=[
                    # resident conv matrix: constant index_map -> DMA'd once
                    pl.BlockSpec((HW, HW), lambda i: (0, 0)),
                    # lane-dense input slab: last dim = H*W (full dim)
                    pl.BlockSpec((bc_block, HW), lambda i: (i, 0)),
                ],
                out_specs=pl.BlockSpec((bc_block, HW), lambda i: (i, 0)),
            ),
            compiler_params=pltpu.CompilerParams(
                dimension_semantics=("parallel",),
                vmem_limit_bytes=vmem_limit,
            ),
        )(m, x2)
        return out2.reshape(B, C, H, W)

    # VPU/XLU tap path (HW too large for a resident conv matrix).
    # TODO(synk): add an H-tiling grid axis with a (Kh-1)-row halo for very
    # large H*W so the 8-row block floor cannot overflow the VMEM budget.
    sep = _try_separate(filt)
    if sep is not None:
        f1 = jnp.concatenate([jnp.asarray(sep[0]), jnp.asarray(sep[1])])
        n_f = Kh + Kw
    else:
        f1 = jnp.asarray(filt, jnp.float32).reshape(Kh * Kw)
        n_f = Kh * Kw

    bc_block = _pick_bc_block(BC, HW, x.dtype.itemsize, slab_bytes)
    grid = (pl.cdiv(BC, bc_block),)
    kernel = _make_tap_kernel(Kh, Kw, H, W, HW, sep is not None)

    out2 = pl.pallas_call(
        kernel,
        out_shape=jax.ShapeDtypeStruct((BC, HW), x.dtype),
        grid_spec=pltpu.PrefetchScalarGridSpec(
            num_scalar_prefetch=0,
            grid=grid,
            in_specs=[
                # tiny filter, flattened -> 1-D SMEM (no 2-D SMEM padding)
                pl.BlockSpec((n_f,), lambda i: (0,),
                             memory_space=pltpu.MemorySpace.SMEM),
                pl.BlockSpec((bc_block, HW), lambda i: (i, 0)),
            ],
            out_specs=pl.BlockSpec((bc_block, HW), lambda i: (i, 0)),
        ),
        compiler_params=pltpu.CompilerParams(
            dimension_semantics=("parallel",),
            vmem_limit_bytes=vmem_limit,
        ),
    )(f1, x2)
    return out2.reshape(B, C, H, W)


# ---------------------------------------------------------------------------
# Pure-JAX reference: replicate pad + depthwise conv, same filter per channel.
# ---------------------------------------------------------------------------
def _reference(x, filt):
    B, C, H, W = x.shape
    Kh, Kw = filt.shape
    ph, pw = Kh - 1, Kw - 1
    xp = jnp.pad(x, ((0, 0), (0, 0), (ph // 2, ph - ph // 2), (pw // 2, pw - pw // 2)),
                 mode="edge")
    w = jnp.tile(filt[None, None].astype(x.dtype), (C, 1, 1, 1))   # (C,1,Kh,Kw)
    return jax.lax.conv_general_dilated(
        xp, w, window_strides=(1, 1), padding="VALID",
        dimension_numbers=("NCHW", "OIHW", "NCHW"),
        feature_group_count=C,
        precision=jax.lax.Precision.HIGHEST,
    )


if __name__ == "__main__":
    key = jax.random.PRNGKey(0)

    # Small shapes consistent with the module: batch=2, num_channels=4, 16x16 spatial.
    B, C, H, W = 2, 4, 16, 16
    x = jax.random.normal(key, (B, C, H, W), dtype=jnp.float32)

    # Fixed 3x3 Gaussian-like blur tiled over all channels (requires_grad=False).
    filt_np = np.array([[1.0, 2.0, 1.0],
                        [2.0, 4.0, 2.0],
                        [1.0, 2.0, 1.0]], dtype=np.float32)
    filt_np /= filt_np.sum()
    filt = jnp.asarray(filt_np)
    ref = _reference(x, filt)

    # 1) default path (MXU, resident conv matrix)
    out_mxu = jax.block_until_ready(filter_layer_forward(x, filt))
    np.testing.assert_allclose(np.asarray(out_mxu), np.asarray(ref), rtol=1e-4, atol=1e-4)

    # 2) tap path, separable fast path (Gaussian blur is rank-1)
    out_sep = jax.block_until_ready(filter_layer_forward(x, filt, use_mxu=False))
    np.testing.assert_allclose(np.asarray(out_sep), np.asarray(ref), rtol=1e-5, atol=1e-5)

    # 3) non-separable 5x5 filter: MXU path and full tap path
    filt5 = jax.random.normal(jax.random.PRNGKey(1), (5, 5), dtype=jnp.float32)
    ref5 = _reference(x, filt5)
    out5_mxu = jax.block_until_ready(filter_layer_forward(x, filt5))
    np.testing.assert_allclose(np.asarray(out5_mxu), np.asarray(ref5), rtol=1e-4, atol=1e-4)
    out5_tap = jax.block_until_ready(filter_layer_forward(x, filt5, use_mxu=False))
    np.testing.assert_allclose(np.asarray(out5_tap), np.asarray(ref5), rtol=1e-4, atol=1e-4)

    # 4) bf16 I/O stays bf16 end-to-end (halves HBM bytes on v5e)
    xb = x.astype(jnp.bfloat16)
    outb = jax.block_until_ready(filter_layer_forward(xb, filt))
    refb = _reference(xb.astype(jnp.float32), filt)
    np.testing.assert_allclose(np.asarray(outb.astype(jnp.float32)), np.asarray(refb),
                               rtol=2e-2, atol=2e-2)

    print("KERNEL_OK")
</pallas_src>

<mosaic_0001>
module attributes {stable_mosaic.version = 11 : i64} {
  func.func @_mxu_kernel(%arg0: i32, %arg1: memref<256x256xf32, #tpu.memory_space<vmem>>, %arg2: memref<8x256xf32, #tpu.memory_space<vmem>>, %arg3: memref<8x256xf32, #tpu.memory_space<vmem>>) attributes {dimension_semantics = [#tpu.dimension_semantics<parallel>], iteration_bounds = array<i64: 1>, scalar_prefetch = 0 : i64, scratch_operands = 0 : i64, tpu.core_type = #tpu.core_type<tc>, window_params = [{pipeline_mode = #tpu.pipeline_mode<synchronous>, transform_indices = @transform_0, window_bounds = array<i64: 256, 256>}, {transform_indices = @transform_1, window_bounds = array<i64: 8, 256>}, {transform_indices = @transform_2, window_bounds = array<i64: 8, 256>}]} {
    %c0 = arith.constant 0 : index
    %c0_0 = arith.constant 0 : index
    %0 = vector.load %arg2[%c0, %c0_0] : memref<8x256xf32, #tpu.memory_space<vmem>>, vector<8x256xf32>
    %c0_1 = arith.constant 0 : index
    %c0_2 = arith.constant 0 : index
    %1 = vector.load %arg1[%c0_1, %c0_2] : memref<256x256xf32, #tpu.memory_space<vmem>>, vector<256x256xf32>
    %cst = arith.constant dense<0.000000e+00> : vector<8x256xf32>
    %2 = tpu.matmul %0, %1, %cst {dimension_numbers = #tpu.dot_dimension_numbers<[1], [0], [0], [1], [0, 0, 1, 1], [], []>, precision = #tpu.contract_precision<fp32>} : vector<8x256xf32>, vector<256x256xf32>, vector<8x256xf32> -> vector<8x256xf32>
    %c0_3 = arith.constant 0 : index
    %c0_4 = arith.constant 0 : index
    %3 = vector.load %arg3[%c0_3, %c0_4] : memref<8x256xf32, #tpu.memory_space<vmem>>, vector<8x256xf32>
    tpu.vector_store %arg3[%c0_3, %c0_4], %2 {strides = array<i32>} : memref<8x256xf32, #tpu.memory_space<vmem>>, vector<8x256xf32>,
    return
  }
  func.func @transform_0(%arg0: i32) -> (i32, i32) {
    %c0_i32 = arith.constant 0 : i32
    %c0_i32_0 = arith.constant 0 : i32
    %c0_i32_1 = arith.constant 0 : i32
    return %c0_i32, %c0_i32_0 : i32, i32
  }
  func.func @transform_1(%arg0: i32) -> (i32, i32) {
    %c0_i32 = arith.constant 0 : i32
    %c0_i32_0 = arith.constant 0 : i32
    return %arg0, %c0_i32 : i32, i32
  }
  func.func @transform_2(%arg0: i32) -> (i32, i32) {
    %c0_i32 = arith.constant 0 : i32
    %c0_i32_0 = arith.constant 0 : i32
    return %arg0, %c0_i32 : i32, i32
  }
}

</mosaic_0001>

<bundles_post_ra>
// kernel: tpu_custom_call.1
= control target key start
LH: loop header
LB: loop body
LE: loop exit
PB: predicated region body
PF: predicated region fallthrough
CT: control target
= control target key end

     0   :  { %7 = vsyncpa [#allocation3], 0  ;;  %s2684_s0 = inlined_call_operand.hbm [shape: f32[256,256], index: 0, kind: input, shape index: {}]   ;;  %s2685_s1 = inlined_call_operand.hbm [shape: f32[8,256], index: 1, kind: input, shape index: {}]   ;;  %s2686_s2 = inlined_call_operand.hbm [shape: f32[8,256], index: 2, kind: output, shape index: {}]  }
   0x1   :  { %8 = vsyncpa [#allocation6], 0 }
   0x2   :  { %9 = vsyncpa [#allocation4], 0  ;;  %s1877_s9 = smov [#allocation2]   ;;  %s1805_s13 = scalar_lea.hbm %s2684_s0, 8192 }
   0x3   :  { %s15_s10 = sshll.u32 %s1877_s9, 4  ;;  %p1806_p0 = scmp.ne.s32.totalorder %s2684_s0, %s1805_s13  ;;  %s16_s10 = int_to_ptr.vmem [resolvable:$true] %s15_s10 }
   0x4   :  { %p1809_p1 = scmp.lt.u32.totalorder %s1805_s13, %s2684_s0 }
   0x6   :  { %p1811_p2 = pnand %p1809_p1, %p1806_p0 }
   0x8   :  { %1814 = shalt.err (!%p1811_p2)
}
   0x9   :  { %s1815_s18 = scalar_lea.vmem %s16_s10, 8192  ;;  %p1820_p4 = scmp.lt.s32.totalorder %s16_s10, %s16_s10 }
   0xa   :  { %p1816_p3 = scmp.ne.s32.totalorder %s16_s10, %s1815_s18  ;;  %p1821_p5 = scmp.lt.s32.totalorder %s1815_s18, %s1815_s18 }
   0xc   :  { %p1822_p6 = por %p1821_p5, %p1820_p4 }
   0xe   :  { %p1823_p7 = pnand %p1822_p6, %p1816_p3 }
  0x10   :  { %1826 = shalt.err (!%p1823_p7)
}
  0x11   :  { %s1878_s19 = smov 256   ;;  %s1879_s20 = smov 16  }
  0x12   :  { %21 = dma.hbm_to_vmem [thread:$0]  %s2684_s0, 8192, %s16_s10, [#allocation3], %s1878_s19, %s1878_s19, %s1879_s20  }
  0x13   :  { %s1880_s23 = smov [#allocation5]   ;;  %s1827_s27 = scalar_lea.hbm %s2685_s1, 256 }
  0x14   :  { %s28_s24 = sshll.u32 %s1880_s23, 4  ;;  %p1828_p8 = scmp.ne.s32.totalorder %s2685_s1, %s1827_s27  ;;  %s29_s24 = int_to_ptr.vmem [resolvable:$true] %s28_s24 }
  0x15   :  { %p1831_p9 = scmp.lt.u32.totalorder %s1827_s27, %s2685_s1 }
  0x17   :  { %p1833_p10 = pnand %p1831_p9, %p1828_p8 }
  0x19   :  { %1836 = shalt.err (!%p1833_p10)
}
  0x1a   :  { %s1837_s4 = scalar_lea.vmem %s29_s24, 256  ;;  %p1842_p12 = scmp.lt.s32.totalorder %s29_s24, %s29_s24 }
  0x1b   :  { %p1838_p11 = scmp.ne.s32.totalorder %s29_s24, %s1837_s4  ;;  %p1843_p13 = scmp.lt.s32.totalorder %s1837_s4, %s1837_s4 }
  0x1d   :  { %p1844_p0 = por %p1843_p13, %p1842_p12 }
  0x1f   :  { %p1845_p1 = pnand %p1844_p0, %p1838_p11 }
  0x21   :  { %1848 = shalt.err (!%p1845_p1)
}
  0x22   :  { %31 = dma.hbm_to_vmem [thread:$0]  %s2685_s1, 256, %s29_s24, [#allocation6]  }
  0x23   :  { %1871 = dma.done.wait [#allocation3], 8192  }
  0x24   :  { %1872 = vsyncadd [#allocation3], 4294959104 }
  0x25   :  { %1873 = dma.done.wait [#allocation6], 256  }
  0x26   :  { %1874 = vsyncadd [#allocation6], 4294967040  ;;  %v41_v0 = vld [vmem:[#allocation2 + $0x8] sm:$0xff]  ;;  %v43_v1 = vld [vmem:[#allocation2 + $0x18] sm:$0xff]  ;;  %s1881_s1 = smov [#allocation7]  }
  0x27   :  { %v40_v2 = vld [vmem:[#allocation2] sm:$0xff]  ;;  %v104_v3 = vand.u32 4294901760, %v41_v0  ;;  %v108_v4 = vand.u32 4294901760, %v43_v1  ;;  %v42_v5 = vld [vmem:[#allocation2 + $0x10] sm:$0xff]  ;;  %v45_v7 = vld [vmem:[#allocation2 + $0x28] sm:$0xff]  ;;  %s1396_s6 = sshll.u32 %s1881_s1, 4  ;;  %s1397_s6 = int_to_ptr.vmem [resolvable:$true] %s1396_s6 }
  0x28   :  { %v106_v6 = vand.u32 4294901760, %v40_v2  ;;  %v47_v8 = vld [vmem:[#allocation2 + $0x38] sm:$0xff]  ;;  %v110_v9 = vand.u32 4294901760, %v42_v5  ;;  %v112_v10 = vand.u32 4294901760, %v45_v7  ;;  %v44_v12 = vld [vmem:[#allocation2 + $0x20] sm:$0xff]  ;;  %v46_v13 = vld [vmem:[#allocation2 + $0x30] sm:$0xff]  ;;  %p1854_p3 = scmp.lt.s32.totalorder %s1397_s6, %s1397_s6 }
  0x29   :  { %v116_v11 = vand.u32 4294901760, %v47_v8  ;;  %v49_v14 = vld [vmem:[#allocation2 + $0x48] sm:$0xff]  ;;  %v1921_v15 = vpack.c.bf16 %v108_v4, %v104_v3  ;;  %v1923_v16 = vld [vmem:[#allocation2 + $0x58] sm:$0xff]  ;;  %v1925_v17 = vld [vmem:[#allocation2 + $0x40] sm:$0xff]  ;;  %v114_v23 = vand.u32 4294901760, %v44_v12  ;;  %v118_v24 = vand.u32 4294901760, %v46_v13 }
  0x2a   :  { %v1927_v18 = vld [vmem:[#allocation2 + $0x50] sm:$0xff]  ;;  %v1929_v19 = vpack.c.bf16 %v110_v9, %v106_v6  ;;  %v53_v21 = vld [vmem:[#allocation2 + $0x68] sm:$0xff]  ;;  %v55_v22 = vld [vmem:[#allocation2 + $0x78] sm:$0xff]  ;;  %v120_v25 = vand.u32 4294901760, %v49_v14  ;;  %v124_v26 = vand.u32 4294901760, %v1923_v16  ;;  %v122_v27 = vand.u32 4294901760, %v1925_v17 }
  0x2b   :  { %2834 = vst [vmem:[#allocation11_spill] sm:$0xff] %v1921_v15  ;;  %v1931_v20 = vpack.c.bf16 %v116_v11, %v112_v10  ;;  %1407 = vmatprep.subr.bf16.mxu1 %v1921_v15  ;;  %1599 = vmatprep.subr.bf16.mxu0 %v1921_v15  ;;  %v126_v28 = vand.u32 4294901760, %v1927_v18  ;;  %v1942_v29 = vpack.c.bf16 %v118_v24, %v114_v23  ;;  %v128_v30 = vand.u32 4294901760, %v53_v21  ;;  %v52_v32 = vld [vmem:[#allocation2 + $0x60] sm:$0xff]  ;;  %v54_v33 = vld [vmem:[#allocation2 + $0x70] sm:$0xff]  ;;  %v57_v35 = vld [vmem:[#allocation2 + $0x88] sm:$0xff] }
  0x2c   :  { %2835 = vst [vmem:[#allocation12_spill] sm:$0xff] %v1929_v19  ;;  %1409 = vmatpush1.bf16.msra.mxu1 %v1929_v19  ;;  %1601 = vmatpush1.bf16.msra.mxu0 %v1929_v19  ;;  %v132_v31 = vand.u32 4294901760, %v55_v22  ;;  %v1944_v34 = vpack.c.bf16 %v124_v26, %v120_v25  ;;  %v59_v36 = vld [vmem:[#allocation2 + $0x98] sm:$0xff]  ;;  %v130_v38 = vand.u32 4294901760, %v52_v32  ;;  %v134_v39 = vand.u32 4294901760, %v54_v33  ;;  %v56_v43 = vld [vmem:[#allocation2 + $0x80] sm:$0xff] }
  0x2d   :  { %2836 = vst [vmem:[#allocation13_spill] sm:$0xff] %v1931_v20  ;;  %1411 = vmatprep.subr.bf16.mxu1 %v1931_v20  ;;  %1603 = vmatprep.subr.bf16.mxu0 %v1931_v20  ;;  %2837 = vst [vmem:[#allocation14_spill] sm:$0xff] %v1942_v29  ;;  %v1948_v37 = vpack.c.bf16 %v126_v28, %v122_v27  ;;  %v136_v41 = vand.u32 4294901760, %v57_v35  ;;  %v140_v42 = vand.u32 4294901760, %v59_v36  ;;  %v58_v44 = vld [vmem:[#allocation2 + $0x90] sm:$0xff]  ;;  %v61_v48 = vld [vmem:[#allocation2 + $0xa8] sm:$0xff] }
  0x2e   :  { %2838 = vst [vmem:[#allocation15_spill] sm:$0xff] %v1944_v34  ;;  %v1952_v40 = vpack.c.bf16 %v132_v31, %v128_v30  ;;  %v1954_v45 = vsub.f32 %v41_v0, %v104_v3  ;;  %v1956_v46 = vsub.f32 %v43_v1, %v108_v4  ;;  %v1958_v47 = vsub.f32 %v40_v2, %v106_v6  ;;  %v63_v49 = vld [vmem:[#allocation2 + $0xb8] sm:$0xff]  ;;  %v60_v58 = vld [vmem:[#allocation2 + $0xa0] sm:$0xff]  ;;  %v62_v59 = vld [vmem:[#allocation2 + $0xb0] sm:$0xff]  ;;  %s1849_s7 = scalar_lea.vmem %s1397_s6, 256 }
  0x2f   :  { %2839 = vst [vmem:[#allocation16_spill] sm:$0xff] %v1948_v37  ;;  %v1960_v50 = vsub.f32 %v42_v5, %v110_v9  ;;  %v1962_v51 = vsub.f32 %v45_v7, %v112_v10  ;;  %v1964_v52 = vsub.f32 %v47_v8, %v116_v11  ;;  %v1966_v53 = vsub.f32 %v44_v12, %v114_v23  ;;  %v65_v0 = vld [vmem:[#allocation2 + $0xc8] sm:$0xff]  ;;  %v67_v1 = vld [vmem:[#allocation2 + $0xd8] sm:$0xff]  ;;  %v64_v10 = vld [vmem:[#allocation2 + $0xc0] sm:$0xff]  ;;  %p1850_p2 = scmp.ne.s32.totalorder %s1397_s6, %s1849_s7  ;;  %p1855_p4 = scmp.lt.s32.totalorder %s1849_s7, %s1849_s7 }
  0x30   :  { %1413 = vmatpush1.bf16.msra.mxu1 %v1942_v29  ;;  %1605 = vmatpush1.bf16.msra.mxu0 %v1942_v29  ;;  %2840 = vst [vmem:[#allocation17_spill] sm:$0xff] %v1952_v40  ;;  %2841 = vst [vmem:[#allocation18_spill] sm:$0xff] %v1954_v45  ;;  %v1968_v54 = vsub.f32 %v46_v13, %v118_v24  ;;  %v1972_v55 = vpack.c.bf16 %v134_v39, %v130_v38  ;;  %v138_v56 = vand.u32 4294901760, %v56_v43  ;;  %v66_v11 = vld [vmem:[#allocation2 + $0xd0] sm:$0xff]  ;;  %v71_v23 = vld [vmem:[#allocation2 + $0xf8] sm:$0xff] }
  0x31   :  { %1415 = vmatprep.subr.bf16.mxu1 %v1944_v34  ;;  %1607 = vmatprep.subr.bf16.mxu0 %v1944_v34  ;;  %2842 = vst [vmem:[#allocation19_spill] sm:$0xff] %v1956_v46  ;;  %2843 = vst [vmem:[#allocation20_spill] sm:$0xff] %v1958_v47  ;;  %v142_v57 = vand.u32 4294901760, %v58_v44  ;;  %v1974_v60 = vsub.f32 %v49_v14, %v120_v25  ;;  %v1978_v61 = vpack.c.bf16 %v140_v42, %v136_v41  ;;  %v83_v34 = vld [vmem:[#allocation2 + $0x158] sm:$0xff]  ;;  %v80_v20 = vld [vmem:[#allocation2 + $0x140] sm:$0xff]  ;;  %p1856_p5 = por %p1855_p4, %p1854_p3 }
  0x32   :  { %2844 = vst [vmem:[#allocation21_spill] sm:$0xff] %v1960_v50  ;;  %2845 = vst [vmem:[#allocation22_spill] sm:$0xff] %v1962_v51  ;;  %v144_v62 = vand.u32 4294901760, %v61_v48  ;;  %v148_v63 = vand.u32 4294901760, %v63_v49  ;;  %v1981_v2 = vsub.f32 %v1923_v16, %v124_v26  ;;  %v1984_v3 = vsub.f32 %v1925_v17, %v122_v27 }
  0x33   :  { %2846 = vst [vmem:[#allocation23_spill] sm:$0xff] %v1964_v52  ;;  %2847 = vst [vmem:[#allocation24_spill] sm:$0xff] %v1972_v55  ;;  %v1987_v4 = vsub.f32 %v1927_v18, %v126_v28  ;;  %v1989_v5 = vsub.f32 %v53_v21, %v128_v30  ;;  %v1991_v6 = vsub.f32 %v55_v22, %v132_v31  ;;  %v146_v8 = vand.u32 4294901760, %v60_v58  ;;  %v69_v22 = vld [vmem:[#allocation2 + $0xe8] sm:$0xff]  ;;  %v68_v28 = vld [vmem:[#allocation2 + $0xe0] sm:$0xff]  ;;  %p1857_p6 = pnand %p1856_p5, %p1850_p2 }
  0x34   :  { %1417 = vmatpush1.bf16.msra.mxu1 %v1948_v37  ;;  %1609 = vmatpush1.bf16.msra.mxu0 %v1948_v37  ;;  %2848 = vst [vmem:[#allocation25_spill] sm:$0xff] %v1978_v61  ;;  %2849 = vst [vmem:[#allocation26_spill] sm:$0xff] %v1984_v3  ;;  %v1993_v7 = vsub.f32 %v52_v32, %v130_v38  ;;  %v150_v9 = vand.u32 4294901760, %v62_v59  ;;  %v1996_v12 = vsub.f32 %v54_v33, %v134_v39  ;;  %v70_v30 = vld [vmem:[#allocation2 + $0xf0] sm:$0xff]  ;;  %v75_v38 = vld [vmem:[#allocation2 + $0x118] sm:$0xff] }
  0x35   :  { %1419 = vmatprep.subr.bf16.mxu1 %v1952_v40  ;;  %1611 = vmatprep.subr.bf16.mxu0 %v1952_v40  ;;  %2850 = vst [vmem:[#allocation27_spill] sm:$0xff] %v1987_v4  ;;  %2851 = vst [vmem:[#allocation28_spill] sm:$0xff] %v1989_v5  ;;  %v1999_v13 = vpack.c.bf16 %v142_v57, %v138_v56  ;;  %v152_v14 = vand.u32 4294901760, %v65_v0  ;;  %v156_v16 = vand.u32 4294901760, %v67_v1  ;;  %v154_v26 = vand.u32 4294901760, %v64_v10 }
  0x36   :  { %2852 = vst [vmem:[#allocation29_spill] sm:$0xff] %v1993_v7  ;;  %2853 = vst [vmem:[#allocation30_spill] sm:$0xff] %v1996_v12  ;;  %v2002_v17 = vsub.f32 %v57_v35, %v136_v41  ;;  %v2004_v18 = vsub.f32 %v59_v36, %v140_v42  ;;  %v2007_v21 = vpack.c.bf16 %v148_v63, %v144_v62  ;;  %v158_v27 = vand.u32 4294901760, %v66_v11  ;;  %v73_v36 = vld [vmem:[#allocation2 + $0x108] sm:$0xff] }
  0x37   :  { %2854 = vst [vmem:[#allocation31_spill] sm:$0xff] %v1999_v13  ;;  %v2009_v24 = vsub.f32 %v56_v43, %v138_v56  ;;  %v2011_v25 = vsub.f32 %v58_v44, %v142_v57  ;;  %v2013_v31 = vsub.f32 %v61_v48, %v144_v62  ;;  %v2015_v32 = vsub.f32 %v63_v49, %v148_v63  ;;  %v72_v44 = vld [vmem:[#allocation2 + $0x100] sm:$0xff]  ;;  %v74_v48 = vld [vmem:[#allocation2 + $0x110] sm:$0xff]  ;;  %v77_v62 = vld [vmem:[#allocation2 + $0x128] sm:$0xff] }
  0x38   :  { %1421 = vmatpush1.bf16.msra.mxu1 %v1972_v55  ;;  %1613 = vmatpush1.bf16.msra.mxu0 %v1972_v55  ;;  %2855 = vst [vmem:[#allocation32_spill] sm:$0xff] %v2002_v17  ;;  %2856 = vst [vmem:[#allocation33_spill] sm:$0xff] %v2004_v18  ;;  %v2017_v33 = vpack.c.bf16 %v150_v9, %v146_v8  ;;  %v2019_v35 = vsub.f32 %v60_v58, %v146_v8  ;;  %v160_v42 = vand.u32 4294901760, %v69_v22  ;;  %v79_v63 = vld [vmem:[#allocation2 + $0x138] sm:$0xff]  ;;  %v78_v55 = vld [vmem:[#allocation2 + $0x130] sm:$0xff] }
  0x39   :  { %1423 = vmatprep.subr.bf16.mxu1 %v1978_v61  ;;  %1615 = vmatprep.subr.bf16.mxu0 %v1978_v61  ;;  %2857 = vst [vmem:[#allocation34_spill] sm:$0xff] %v2007_v21  ;;  %2858 = vst [vmem:[#allocation35_spill] sm:$0xff] %v2009_v24  ;;  %v2023_v39 = vsub.f32 %v62_v59, %v150_v9  ;;  %v2025_v41 = vpack.c.bf16 %v156_v16, %v152_v14  ;;  %v164_v43 = vand.u32 4294901760, %v71_v23  ;;  %v76_v61 = vld [vmem:[#allocation2 + $0x120] sm:$0xff] }
  0x3a   :  { %2859 = vst [vmem:[#allocation36_spill] sm:$0xff] %v2011_v25  ;;  %2860 = vst [vmem:[#allocation37_spill] sm:$0xff] %v2013_v31  ;;  %v2029_v49 = vsub.f32 %v65_v0, %v152_v14  ;;  %v2031_v56 = vsub.f32 %v67_v1, %v156_v16  ;;  %v162_v57 = vand.u32 4294901760, %v68_v28  ;;  %v166_v58 = vand.u32 4294901760, %v70_v30 }
  0x3b   :  { %2861 = vst [vmem:[#allocation38_spill] sm:$0xff] %v2015_v32  ;;  %2862 = vst [vmem:[#allocation39_spill] sm:$0xff] %v2017_v33  ;;  %v2033_v59 = vpack.c.bf16 %v158_v27, %v154_v26  ;;  %v2035_v8 = vsub.f32 %v64_v10, %v154_v26  ;;  %v168_v9 = vand.u32 4294901760, %v73_v36  ;;  %v2037_v40 = vsub.f32 %v66_v11, %v158_v27 }
  0x3c   :  { %2863 = vst [vmem:[#allocation40_spill] sm:$0xff] %v2019_v35  ;;  %1425 = vmatpush1.bf16.msra.mxu1 %v1999_v13  ;;  %1617 = vmatpush1.bf16.msra.mxu0 %v1999_v13  ;;  %2864 = vst [vmem:[#allocation41_spill] sm:$0xff] %v2023_v39  ;;  %v172_v13 = vand.u32 4294901760, %v75_v38  ;;  %v2039_v37 = vsub.f32 %v69_v22, %v160_v42  ;;  %v170_v0 = vand.u32 4294901760, %v72_v44  ;;  %v174_v14 = vand.u32 4294901760, %v74_v48 }
  0x3d   :  { %2865 = vst [vmem:[#allocation42_spill] sm:$0xff] %v2025_v41  ;;  %1427 = vmatprep.subr.bf16.mxu1 %v2007_v21  ;;  %1619 = vmatprep.subr.bf16.mxu0 %v2007_v21  ;;  %2866 = vst [vmem:[#allocation43_spill] sm:$0xff] %v2029_v49  ;;  %v2043_v1 = vpack.c.bf16 %v164_v43, %v160_v42  ;;  %v2045_v16 = vsub.f32 %v71_v23, %v164_v43  ;;  %v176_v10 = vand.u32 4294901760, %v77_v62  ;;  %v81_v21 = vld [vmem:[#allocation2 + $0x148] sm:$0xff] }
  0x3e   :  { %2867 = vst [vmem:[#allocation44_spill] sm:$0xff] %v2031_v56  ;;  %2868 = vst [vmem:[#allocation45_spill] sm:$0xff] %v2033_v59  ;;  %v180_v26 = vand.u32 4294901760, %v79_v63  ;;  %v2049_v11 = vpack.c.bf16 %v166_v58, %v162_v57  ;;  %v2051_v22 = vsub.f32 %v68_v28, %v162_v57  ;;  %v178_v27 = vand.u32 4294901760, %v76_v61  ;;  %v85_v28 = vld [vmem:[#allocation2 + $0x168] sm:$0xff]  ;;  %v87_v57 = vld [vmem:[#allocation2 + $0x178] sm:$0xff] }
  0x3f   :  { %2869 = vst [vmem:[#allocation46_spill] sm:$0xff] %v2035_v8  ;;  %2870 = vst [vmem:[#allocation47_spill] sm:$0xff] %v2037_v40  ;;  %v182_v29 = vand.u32 4294901760, %v78_v55  ;;  %v2053_v42 = vsub.f32 %v70_v30, %v166_v58  ;;  %v2055_v23 = vpack.c.bf16 %v172_v13, %v168_v9  ;;  %v2057_v43 = vsub.f32 %v73_v36, %v168_v9 }
  0x40   :  { %2871 = vst [vmem:[#allocation48_spill] sm:$0xff] %v2039_v37  ;;  %1429 = vmatpush1.bf16.msra.mxu1 %v2017_v33  ;;  %1621 = vmatpush1.bf16.msra.mxu0 %v2017_v33  ;;  %2872 = vst [vmem:[#allocation49_spill] sm:$0xff] %v2043_v1  ;;  %v82_v33 = vld [vmem:[#allocation2 + $0x150] sm:$0xff]  ;;  %v2059_v19 = vsub.f32 %v75_v38, %v172_v13  ;;  %v2061_v15 = vpack.c.bf16 %v174_v14, %v170_v0  ;;  %v188_v37 = vand.u32 4294901760, %v83_v34  ;;  %v84_v13 = vld [vmem:[#allocation2 + $0x160] sm:$0xff] }
  0x41   :  { %2873 = vst [vmem:[#allocation50_spill] sm:$0xff] %v2045_v16  ;;  %1431 = vmatprep.subr.bf16.mxu1 %v2025_v41  ;;  %1623 = vmatprep.subr.bf16.mxu0 %v2025_v41  ;;  %2874 = vst [vmem:[#allocation51_spill] sm:$0xff] %v2049_v11  ;;  %v2063_v16 = vsub.f32 %v72_v44, %v170_v0  ;;  %v184_v41 = vand.u32 4294901760, %v81_v21  ;;  %v2067_v30 = vsub.f32 %v74_v48, %v174_v14  ;;  %v86_v38 = vld [vmem:[#allocation2 + $0x170] sm:$0xff] }
  0x42   :  { %2875 = vst [vmem:[#allocation52_spill] sm:$0xff] %v2051_v22  ;;  %2876 = vst [vmem:[#allocation53_spill] sm:$0xff] %v2053_v42  ;;  %v2069_v58 = vpack.c.bf16 %v180_v26, %v176_v10  ;;  %v186_v36 = vand.u32 4294901760, %v80_v20  ;;  %v190_v9 = vand.u32 4294901760, %v82_v33  ;;  %v2073_v44 = vsub.f32 %v77_v62, %v176_v10  ;;  %v88_v42 = vld [vmem:[#allocation2 + $0x180] sm:$0xff]  ;;  %v90_v22 = vld [vmem:[#allocation2 + $0x190] sm:$0xff] }
  0x43   :  { %2877 = vst [vmem:[#allocation54_spill] sm:$0xff] %v2055_v23  ;;  %2878 = vst [vmem:[#allocation55_spill] sm:$0xff] %v2057_v43  ;;  %v2075_v0 = vsub.f32 %v79_v63, %v180_v26  ;;  %v2079_v48 = vsub.f32 %v76_v61, %v178_v27  ;;  %v2081_v14 = vsub.f32 %v78_v55, %v182_v29  ;;  %v196_v43 = vand.u32 4294901760, %v87_v57  ;;  %v93_v63 = vld [vmem:[#allocation2 + $0x1a8] sm:$0xff]  ;;  %v95_v26 = vld [vmem:[#allocation2 + $0x1b8] sm:$0xff] }
  0x44   :  { %2879 = vst [vmem:[#allocation56_spill] sm:$0xff] %v2059_v19  ;;  %2880 = vst [vmem:[#allocation57_spill] sm:$0xff] %v2061_v15  ;;  %1433 = vmatpush1.bf16.msra.mxu1 %v2033_v59  ;;  %1625 = vmatpush1.bf16.msra.mxu0 %v2033_v59  ;;  %v89_v19 = vld [vmem:[#allocation2 + $0x188] sm:$0xff]  ;;  %v91_v59 = vld [vmem:[#allocation2 + $0x198] sm:$0xff]  ;;  %v2083_v40 = vpack.c.bf16 %v188_v37, %v184_v41  ;;  %v2085_v8 = vsub.f32 %v81_v21, %v184_v41  ;;  %v194_v62 = vand.u32 4294901760, %v84_v13 }
  0x45   :  { %2881 = vst [vmem:[#allocation58_spill] sm:$0xff] %v2063_v16  ;;  %2882 = vst [vmem:[#allocation59_spill] sm:$0xff] %v2067_v30  ;;  %1435 = vmatprep.subr.bf16.mxu1 %v2043_v1  ;;  %1627 = vmatprep.subr.bf16.mxu0 %v2043_v1  ;;  %v2077_v16 = vpack.c.bf16 %v182_v29, %v178_v27  ;;  %v192_v30 = vand.u32 4294901760, %v85_v28  ;;  %v198_v10 = vand.u32 4294901760, %v86_v38  ;;  %v200_v55 = vand.u32 4294901760, %v89_v19 }
  0x46   :  { %2883 = vst [vmem:[#allocation60_spill] sm:$0xff] %v2069_v58  ;;  %2884 = vst [vmem:[#allocation61_spill] sm:$0xff] %v2073_v44  ;;  %v2089_v61 = vsub.f32 %v83_v34, %v188_v37  ;;  %v2091_v29 = vpack.c.bf16 %v190_v9, %v186_v36  ;;  %v204_v27 = vand.u32 4294901760, %v91_v59  ;;  %v2095_v21 = vsub.f32 %v80_v20, %v186_v36 }
  0x47   :  { %2885 = vst [vmem:[#allocation62_spill] sm:$0xff] %v2075_v0  ;;  %2886 = vst [vmem:[#allocation63_spill] sm:$0xff] %v2077_v16  ;;  %v2097_v41 = vsub.f32 %v82_v33, %v190_v9  ;;  %v202_v1 = vand.u32 4294901760, %v88_v42  ;;  %v208_v34 = vand.u32 4294901760, %v93_v63  ;;  %v212_v37 = vand.u32 4294901760, %v95_v26  ;;  %v39_v33 = vld [vmem:[#allocation5 + $0x8] sm:$0xff] }
  0x48   :  { %2887 = vst [vmem:[#allocation64_spill] sm:$0xff] %v2079_v48  ;;  %2888 = vst [vmem:[#allocation65_spill] sm:$0xff] %v2081_v14  ;;  %1437 = vmatpush1.bf16.msra.mxu1 %v2049_v11  ;;  %1629 = vmatpush1.bf16.msra.mxu0 %v2049_v11  ;;  %v2099_v14 = vpack.c.bf16 %v196_v43, %v192_v30  ;;  %v2101_v48 = vsub.f32 %v85_v28, %v192_v30  ;;  %v92_v11 = vld [vmem:[#allocation2 + $0x1a0] sm:$0xff]  ;;  %v97_v9 = vld [vmem:[#allocation2 + $0x1c8] sm:$0xff] }
  0x49   :  { %2889 = vst [vmem:[#allocation66_spill] sm:$0xff] %v2083_v40  ;;  %2890 = vst [vmem:[#allocation67_spill] sm:$0xff] %v2085_v8  ;;  %1439 = vmatprep.subr.bf16.mxu1 %v2055_v23  ;;  %1631 = vmatprep.subr.bf16.mxu0 %v2055_v23  ;;  %v206_v8 = vand.u32 4294901760, %v90_v22  ;;  %v2103_v0 = vsub.f32 %v87_v57, %v196_v43  ;;  %v2105_v44 = vpack.c.bf16 %v198_v10, %v194_v62  ;;  %v99_v43 = vld [vmem:[#allocation2 + $0x1d8] sm:$0xff]  ;;  %v38_v57 = vld [vmem:[#allocation5] sm:$0xff] }
  0x4a   :  { %2891 = vst [vmem:[#allocation68_spill] sm:$0xff] %v2089_v61  ;;  %2892 = vst [vmem:[#allocation69_spill] sm:$0xff] %v2091_v29  ;;  %v94_v61 = vld [vmem:[#allocation2 + $0x1b0] sm:$0xff]  ;;  %v2107_v56 = vsub.f32 %v84_v13, %v194_v62  ;;  %v2109_v20 = vsub.f32 %v86_v38, %v198_v10  ;;  %v2113_v36 = vpack.c.bf16 %v204_v27, %v200_v55  ;;  %v210_v62 = vand.u32 4294901760, %v92_v11 }
  0x4b   :  { %2893 = vst [vmem:[#allocation70_spill] sm:$0xff] %v2095_v21  ;;  %2894 = vst [vmem:[#allocation71_spill] sm:$0xff] %v2097_v41  ;;  %v2115_v28 = vsub.f32 %v89_v19, %v200_v55  ;;  %v2117_v30 = vsub.f32 %v91_v59, %v204_v27  ;;  %v2121_v13 = vpack.c.bf16 %v206_v8, %v202_v1  ;;  %v214_v10 = vand.u32 4294901760, %v94_v61  ;;  %v98_v23 = vld [vmem:[#allocation2 + $0x1d0] sm:$0xff] }
  0x4c   :  { %2895 = vst [vmem:[#allocation72_spill] sm:$0xff] %v2099_v14  ;;  %2896 = vst [vmem:[#allocation73_spill] sm:$0xff] %v2101_v48  ;;  %1441 = vmatpush1.bf16.msra.mxu1 %v2061_v15  ;;  %1633 = vmatpush1.bf16.msra.mxu0 %v2061_v15  ;;  %v2123_v38 = vsub.f32 %v88_v42, %v202_v1  ;;  %v96_v15 = vld [vmem:[#allocation2 + $0x1c0] sm:$0xff]  ;;  %v2127_v19 = vpack.c.bf16 %v212_v37, %v208_v34  ;;  %v2131_v55 = vand.u32 4294901760, %v39_v33  ;;  %v101_v42 = vld [vmem:[#allocation2 + $0x1e8] sm:$0xff] }
  0x4d   :  { %2897 = vst [vmem:[#allocation74_spill] sm:$0xff] %v2103_v0  ;;  %2898 = vst [vmem:[#allocation75_spill] sm:$0xff] %v2105_v44  ;;  %1443 = vmatprep.subr.bf16.mxu1 %v2069_v58  ;;  %1635 = vmatprep.subr.bf16.mxu0 %v2069_v58  ;;  %v2129_v59 = vsub.f32 %v93_v63, %v208_v34  ;;  %v2133_v27 = vsub.f32 %v95_v26, %v212_v37  ;;  %v220_v58 = vand.u32 4294901760, %v99_v43 }
  0x4e   :  { %2899 = vst [vmem:[#allocation76_spill] sm:$0xff] %v2107_v56  ;;  %2900 = vst [vmem:[#allocation77_spill] sm:$0xff] %v2109_v20  ;;  %v2125_v20 = vsub.f32 %v90_v22, %v206_v8  ;;  %v2139_v1 = vsub.f32 %v92_v11, %v210_v62  ;;  %v218_v8 = vand.u32 4294901760, %v96_v15  ;;  %v222_v22 = vand.u32 4294901760, %v98_v23 }
  0x4f   :  { %2901 = vst [vmem:[#allocation78_spill] sm:$0xff] %v2113_v36  ;;  %2902 = vst [vmem:[#allocation79_spill] sm:$0xff] %v2115_v28  ;;  %v2135_v28 = vand.u32 4294901760, %v38_v57  ;;  %v2142_v63 = vsub.f32 %v39_v33, %v2131_v55  ;;  %v2146_v26 = vpack.c.bf16 %v214_v10, %v210_v62  ;;  %v2148_v34 = vsub.f32 %v94_v61, %v214_v10 }
  0x50   :  { %2903 = vst [vmem:[#allocation80_spill] sm:$0xff] %v2117_v30  ;;  %2904 = vst [vmem:[#allocation81_spill] sm:$0xff] %v2121_v13  ;;  %v216_v30 = vand.u32 4294901760, %v97_v9  ;;  %1445 = vmatpush1.bf16.msra.mxu1 %v2077_v16  ;;  %1637 = vmatpush1.bf16.msra.mxu0 %v2077_v16  ;;  %v251_v11 = vand.u32 4294901760, %v1954_v45  ;;  %v257_v33 = vand.u32 4294901760, %v1958_v47  ;;  %v224_v62 = vand.u32 4294901760, %v101_v42 }
  0x51   :  { %2905 = vst [vmem:[#allocation82_spill] sm:$0xff] %v2123_v38  ;;  %2906 = vst [vmem:[#allocation83_spill] sm:$0xff] %v2125_v20  ;;  %1447 = vmatprep.subr.bf16.mxu1 %v2083_v40  ;;  %1639 = vmatprep.subr.bf16.mxu0 %v2083_v40  ;;  %v234_v16 = vand.u32 4294901760, %v2142_v63  ;;  %v2159_v40 = vsub.f32 %v99_v43, %v220_v58  ;;  %v2162_v61 = vsub.f32 %v38_v57, %v2135_v28 }
  0x52   :  { %2907 = vst [vmem:[#allocation84_spill] sm:$0xff] %v2127_v19  ;;  %2908 = vst [vmem:[#allocation85_spill] sm:$0xff] %v2129_v59  ;;  %v2150_v37 = vsub.f32 %v97_v9, %v216_v30  ;;  %v269_v59 = vand.u32 4294901760, %v1960_v50  ;;  %v2157_v20 = vpack.c.bf16 %v220_v58, %v216_v30  ;;  %v2166_v9 = vpack.c.bf16 %v222_v22, %v218_v8 }
  0x53   :  { %2909 = vst [vmem:[#allocation86_spill] sm:$0xff] %v2131_v55  ;;  %2910 = vst [vmem:[#allocation87_spill] sm:$0xff] %v2133_v27  ;;  %v103_v27 = vld [vmem:[#allocation2 + $0x1f8] sm:$0xff]  ;;  %v235_v38 = vsub.f32 %v2142_v63, %v234_v16  ;;  %v275_v30 = vand.u32 4294901760, %v1962_v51  ;;  %v2172_v58 = vsub.f32 %v96_v15, %v218_v8  ;;  %v2174_v43 = vsub.f32 %v98_v23, %v222_v22 }
  0x54   :  { %2911 = vst [vmem:[#allocation88_spill] sm:$0xff] %v2135_v28  ;;  %2912 = vst [vmem:[#allocation89_spill] sm:$0xff] %v2139_v1  ;;  %v263_v1 = vand.u32 4294901760, %v1956_v46  ;;  %1449 = vmatpush1.bf16.msra.mxu1 %v2091_v29  ;;  %1641 = vmatpush1.bf16.msra.mxu0 %v2091_v29  ;;  %v228_v10 = vand.u32 4294901760, %v103_v27  ;;  %v252_v57 = vsub.f32 %v1954_v45, %v251_v11  ;;  %v287_v29 = vand.u32 4294901760, %v1964_v52 }
  0x55   :  { %2913 = vst [vmem:[#allocation90_spill] sm:$0xff] %v2142_v63  ;;  %2914 = vst [vmem:[#allocation91_spill] sm:$0xff] %v2146_v26  ;;  %1451 = vmatprep.subr.bf16.mxu1 %v2099_v14  ;;  %1643 = vmatprep.subr.bf16.mxu0 %v2099_v14  ;;  %v236_v28 = vand.u32 4294901760, %v235_v38  ;;  %v258_v63 = vsub.f32 %v1958_v47, %v257_v33  ;;  %v270_v56 = vsub.f32 %v1960_v50, %v269_v59 }
  0x56   :  { %2915 = vst [vmem:[#allocation92_spill] sm:$0xff] %v2148_v34  ;;  %2916 = vst [vmem:[#allocation93_spill] sm:$0xff] %v2150_v37  ;;  %v100_v37 = vld [vmem:[#allocation2 + $0x1e0] sm:$0xff]  ;;  %v102_v34 = vld [vmem:[#allocation2 + $0x1f0] sm:$0xff]  ;;  %976 = vmatprep.mubr.f32.mxu0 %v234_v16  ;;  %v2181_v0 = vsub.f32 %v101_v42, %v224_v62  ;;  %v276_v23 = vsub.f32 %v1962_v51, %v275_v30  ;;  %v288_v38 = vsub.f32 %v1964_v52, %v287_v29 }
  0x57   :  { %2917 = vst [vmem:[#allocation94_spill] sm:$0xff] %v2157_v20  ;;  %2918 = vst [vmem:[#allocation95_spill] sm:$0xff] %v2159_v40  ;;  %v264_v40 = vsub.f32 %v1956_v46, %v263_v1  ;;  %v226_v48 = vand.u32 4294901760, %v100_v37  ;;  %v230_v14 = vand.u32 4294901760, %v102_v34  ;;  %v281_v16 = vand.u32 4294901760, %v1966_v53  ;;  %237 = vmatprep.mubr.f32.mxu1 %v236_v28 }
  0x58   :  { %2919 = vst [vmem:[#allocation96_spill] sm:$0xff] %v2162_v61  ;;  %2920 = vst [vmem:[#allocation97_spill] sm:$0xff] %v2166_v9  ;;  %1453 = vmatpush1.bf16.msra.mxu1 %v2105_v44  ;;  %1645 = vmatpush1.bf16.msra.mxu0 %v2105_v44  ;;  %v293_v8 = vand.u32 4294901760, %v1968_v54  ;;  %v2192_v22 = vpack.c.bf16 %v228_v10, %v224_v62  ;;  %v2194_v42 = vsub.f32 %v103_v27, %v228_v10 }
  0x59   :  { %1455 = vmatprep.subr.bf16.mxu1 %v2113_v36  ;;  %1647 = vmatprep.subr.bf16.mxu0 %v2113_v36  ;;  %v2196_v15 = vsub.f32 %v100_v37, %v226_v48  ;;  %v253_v44 = vand.u32 4294901760, %v252_v57  ;;  %v265_v50 = vand.u32 4294901760, %v264_v40  ;;  %v259_v51 = vand.u32 4294901760, %v258_v63 }
  0x5a   :  { %2921 = vst [vmem:[#allocation98_spill] sm:$0xff] %v2192_v22  ;;  %v271_v47 = vand.u32 4294901760, %v270_v56  ;;  %v2198_v52 = vpack.c.bf16 %v230_v14, %v226_v48  ;;  %v2924_v46 = vand.u32 4294901760, %v2162_v61  ;;  %v299_v36 = vand.u32 4294901760, %v1974_v60 }
  0x5b   :  { %2922 = vst [vmem:[#allocation99_spill] sm:$0xff] %v2196_v15  ;;  %v311_v62 = vand.u32 4294901760, %v1981_v2  ;;  %v277_v28 = vand.u32 4294901760, %v276_v23  ;;  %v289_v27 = vand.u32 4294901760, %v288_v38  ;;  %v282_v40 = vsub.f32 %v1966_v53, %v281_v16 }
  0x5c   :  { %2923 = vst [vmem:[#allocation100_spill] sm:$0xff] %v2198_v52  ;;  %v2203_v45 = vsub.f32 %v2162_v61, %v2924_v46  ;;  %1457 = vmatpush1.bf16.msra.mxu1 %v2121_v13  ;;  %1649 = vmatpush1.bf16.msra.mxu0 %v2121_v13  ;;  %v294_v56 = vsub.f32 %v1968_v54, %v293_v8  ;;  %v305_v37 = vand.u32 4294901760, %v1984_v3  ;;  %v317_v38 = vand.u32 4294901760, %v1987_v4 }
  0x5d   :  { %1459 = vmatprep.subr.bf16.mxu1 %v2127_v19  ;;  %1651 = vmatprep.subr.bf16.mxu0 %v2127_v19  ;;  %v2213_v46 = vsub.f32 %v102_v34, %v230_v14  ;;  %v1662_v48 = vpack.c.bf16 %v263_v1, %v251_v11  ;;  %v2215_v63 = vpack.c.bf16 %v269_v59, %v257_v33  ;;  %v341_v1 = vand.u32 4294901760, %v1996_v12 }
  0x5e   :  { %v1470_v10 = vpack.c.bf16 %v265_v50, %v253_v44  ;;  %v2218_v57 = vpack.c.bf16 %v271_v47, %v259_v51  ;;  %v2220_v23 = vpack.c.bf16 %v287_v29, %v275_v30  ;;  %v242_v13 = vand.u32 4294901760, %v2203_v45 }
  0x5f   :  { %2925 = vst [vmem:[#allocation101_spill] sm:$0xff] %v2213_v46  ;;  %v2224_v15 = vpack.c.bf16 %v293_v8, %v281_v16  ;;  %v300_v19 = vsub.f32 %v1974_v60, %v299_v36  ;;  %v312_v14 = vsub.f32 %v1981_v2, %v311_v62  ;;  %v2230_v59 = vpack.c.bf16 %v289_v27, %v277_v28 }
  0x60   :  { %1461 = vmatpush1.bf16.msra.mxu1 %v2146_v26  ;;  %1653 = vmatpush1.bf16.msra.mxu0 %v2146_v26  ;;  %v283_v47 = vand.u32 4294901760, %v282_v40  ;;  %v295_v50 = vand.u32 4294901760, %v294_v56  ;;  %v323_v51 = vand.u32 4294901760, %v1989_v5  ;;  %v306_v45 = vsub.f32 %v1984_v3, %v305_v37 }
  0x61   :  { %1463 = vmatprep.subr.bf16.mxu1 %v2157_v20  ;;  %1655 = vmatprep.subr.bf16.mxu0 %v2157_v20  ;;  %v335_v44 = vand.u32 4294901760, %v1991_v6  ;;  %v329_v29 = vand.u32 4294901760, %v1993_v7  ;;  %v318_v34 = vsub.f32 %v1987_v4, %v317_v38  ;;  %v347_v11 = vand.u32 4294901760, %v2002_v17 }
  0x62   :  { %v359_v33 = vand.u32 4294901760, %v2004_v18  ;;  %v353_v30 = vand.u32 4294901760, %v2009_v24  ;;  %v301_v16 = vand.u32 4294901760, %v300_v19  ;;  %v313_v8 = vand.u32 4294901760, %v312_v14 }
  0x63   :  { %v2243_v28 = vpack.c.bf16 %v311_v62, %v299_v36  ;;  %v365_v27 = vand.u32 4294901760, %v2011_v25  ;;  %v1476_v40 = vpack.c.bf16 %v295_v50, %v283_v47  ;;  %v324_v56 = vsub.f32 %v1989_v5, %v323_v51 }
  0x64   :  { %1465 = vmatpush1.bf16.msra.mxu1 %v2166_v9  ;;  %1657 = vmatpush1.bf16.msra.mxu0 %v2166_v9  ;;  %v371_v20 = vand.u32 4294901760, %v2013_v31  ;;  %v383_v26 = vand.u32 4294901760, %v2015_v32  ;;  %v307_v19 = vand.u32 4294901760, %v306_v45  ;;  %v336_v36 = vsub.f32 %v1991_v6, %v335_v44 }
  0x65   :  { %1467 = vmatprep.subr.bf16.mxu1 %v2192_v22  ;;  %1659 = vmatprep.subr.bf16.mxu0 %v2192_v22  ;;  %v330_v62 = vsub.f32 %v1993_v7, %v329_v29  ;;  %v342_v14 = vsub.f32 %v1996_v12, %v341_v1  ;;  %v319_v46 = vand.u32 4294901760, %v318_v34  ;;  %v348_v47 = vsub.f32 %v2002_v17, %v347_v11 }
  0x66   :  { %v360_v50 = vsub.f32 %v2004_v18, %v359_v33  ;;  %v354_v9 = vsub.f32 %v2009_v24, %v353_v30  ;;  %v1478_v5 = vpack.c.bf16 %v313_v8, %v301_v16  ;;  %v2259_v4 = vpack.c.bf16 %v317_v38, %v305_v37 }
  0x67   :  { %v366_v3 = vsub.f32 %v2011_v25, %v365_v27  ;;  %v377_v45 = vand.u32 4294901760, %v2019_v35  ;;  %v325_v22 = vand.u32 4294901760, %v324_v56  ;;  %v2265_v12 = vpack.c.bf16 %v335_v44, %v323_v51 }
  0x68   :  { %1469 = vmatpush1.bf16.msra.mxu1 %v2198_v52  ;;  %1661 = vmatpush1.bf16.msra.mxu0 %v2198_v52  ;;  %v372_v34 = vsub.f32 %v2013_v31, %v371_v20  ;;  %v384_v18 = vsub.f32 %v2015_v32, %v383_v26  ;;  %v337_v16 = vand.u32 4294901760, %v336_v36  ;;  %v331_v37 = vand.u32 4294901760, %v330_v62  ;;  %v2982_v31 = vld [vmem:[#allocation53_spill] sm:$0xff] }
  0x69   :  { %1471 = vmatprep.subr.bf16.mxu1 %v1470_v10  ;;  %1663 = vmatprep.subr.bf16.mxu0 %v1662_v48  ;;  %v343_v38 = vand.u32 4294901760, %v342_v14  ;;  %v389_v8 = vand.u32 4294901760, %v2023_v39  ;;  %v1480_v25 = vpack.c.bf16 %v319_v46, %v307_v19  ;;  %v349_v24 = vand.u32 4294901760, %v348_v47  ;;  %v2927_v10 = vld [vmem:[#allocation44_spill] sm:$0xff]  ;;  %v2928_v14 = vld [vmem:[#allocation46_spill] sm:$0xff]  ;;  %v2998_v32 = vld [vmem:[#allocation77_spill] sm:$0xff] }
  0x6a   :  { %v361_v17 = vand.u32 4294901760, %v360_v50  ;;  %v355_v7 = vand.u32 4294901760, %v354_v9  ;;  %v2926_v56 = vand.u32 4294901760, %v2162_v61  ;;  %v367_v51 = vand.u32 4294901760, %v366_v3 }
  0x6b   :  { %243 = vmatmul.mubr.f32.vlgmr.msra.gmra.mrb[0].mxu1 %v242_v13  ;;  %v378_v44 = vsub.f32 %v2019_v35, %v377_v45  ;;  %v395_v52 = vand.u32 4294901760, %v2029_v49  ;;  %v407_v48 = vand.u32 4294901760, %v2927_v10  ;;  %v1676_v36 = vpack.c.bf16 %v341_v1, %v329_v29  ;;  %v2931_v1 = vld [vmem:[#allocation50_spill] sm:$0xff]  ;;  %v2940_v35 = vld [vmem:[#allocation64_spill] sm:$0xff] }
  0x6c   :  { %980 = vmatmul.mubr.f32.vlgmr.msra.gmra.mrb[0].mxu0 %v2926_v56  ;;  %1473 = vmatpush1.bf16.msra.mxu1 %v2218_v57  ;;  %v2277_v46 = vpack.c.bf16 %v359_v33, %v347_v11  ;;  %v373_v19 = vand.u32 4294901760, %v372_v34  ;;  %v385_v9 = vand.u32 4294901760, %v384_v18  ;;  %v1482_v3 = vpack.c.bf16 %v337_v16, %v325_v22  ;;  %v2933_v34 = vld [vmem:[#allocation53_spill] sm:$0xff] }
  0x6d   :  { %1665 = vmatpush1.bf16.msra.mxu0 %v2215_v63  ;;  %1475 = vmatprep.subr.bf16.mxu1 %v2230_v59  ;;  %v1484_v13 = vpack.c.bf16 %v343_v38, %v331_v37  ;;  %v390_v62 = vsub.f32 %v2023_v39, %v389_v8  ;;  %v401_v47 = vand.u32 4294901760, %v2928_v14  ;;  %v1486_v50 = vpack.c.bf16 %v361_v17, %v349_v24  ;;  %v2929_v63 = vld [vmem:[#allocation47_spill] sm:$0xff]  ;;  %v2935_v38 = vld [vmem:[#allocation56_spill] sm:$0xff] }
  0x6e   :  { %1667 = vmatprep.subr.bf16.mxu0 %v2220_v23  ;;  %v2283_v56 = vpack.c.bf16 %v365_v27, %v353_v30  ;;  %v2285_v57 = vpack.c.bf16 %v383_v26, %v371_v20  ;;  %v413_v29 = vand.u32 4294901760, %v2929_v63  ;;  %634 = vmatprep.mubr.f32.mxu1 %v2131_v55  ;;  %v2289_v18 = vpack.c.bf16 %v367_v51, %v355_v7  ;;  %v2930_v20 = vld [vmem:[#allocation48_spill] sm:$0xff] }
  0x6f   :  { %v379_v59 = vand.u32 4294901760, %v378_v44  ;;  %v396_v23 = vsub.f32 %v2029_v49, %v395_v52  ;;  %v408_v22 = vsub.f32 %v2927_v10, %v407_v48  ;;  %1243 = vmatprep.mubr.f32.mxu0 %v2131_v55  ;;  %v2295_v17 = vpack.c.bf16 %v385_v9, %v373_v19  ;;  %v2932_v30 = vld [vmem:[#allocation52_spill] sm:$0xff]  ;;  %v2939_v55 = vld [vmem:[#allocation62_spill] sm:$0xff] }
  0x70   :  { %1477 = vmatpush1.bf16.msra.mxu1 %v1476_v40  ;;  %v2297_v24 = vpack.c.bf16 %v389_v8, %v377_v45  ;;  %v419_v26 = vand.u32 4294901760, %v2930_v20  ;;  %v431_v11 = vand.u32 4294901760, %v2931_v1  ;;  %v391_v7 = vand.u32 4294901760, %v390_v62  ;;  %v2934_v45 = vld [vmem:[#allocation55_spill] sm:$0xff] }
  0x71   :  { %1669 = vmatpush1.bf16.msra.mxu0 %v2224_v15  ;;  %1479 = vmatprep.subr.bf16.mxu1 %v1478_v5  ;;  %v402_v33 = vsub.f32 %v2928_v14, %v401_v47  ;;  %v425_v27 = vand.u32 4294901760, %v2932_v30  ;;  %v437_v40 = vand.u32 4294901760, %v2933_v34  ;;  %v2305_v16 = vpack.c.bf16 %v407_v48, %v395_v52  ;;  %v2936_v5 = vld [vmem:[#allocation58_spill] sm:$0xff]  ;;  %v2938_v48 = vld [vmem:[#allocation61_spill] sm:$0xff] }
  0x72   :  { %1671 = vmatprep.subr.bf16.mxu0 %v2243_v28  ;;  %v414_v15 = vsub.f32 %v2929_v63, %v413_v29  ;;  %v443_v37 = vand.u32 4294901760, %v2934_v45  ;;  %v455_v8 = vand.u32 4294901760, %v2935_v38  ;;  %v397_v51 = vand.u32 4294901760, %v396_v23  ;;  %v2937_v28 = vld [vmem:[#allocation59_spill] sm:$0xff] }
  0x73   :  { %v409_v44 = vand.u32 4294901760, %v408_v22  ;;  %v449_v19 = vand.u32 4294901760, %v2936_v5  ;;  %v461_v9 = vand.u32 4294901760, %v2937_v28  ;;  %v420_v62 = vsub.f32 %v2930_v20, %v419_v26 }
  0x74   :  { %1481 = vmatpush1.bf16.msra.mxu1 %v1480_v25  ;;  %v432_v52 = vsub.f32 %v2931_v1, %v431_v11  ;;  %v467_v61 = vand.u32 4294901760, %v2938_v48  ;;  %v479_v63 = vand.u32 4294901760, %v2939_v55  ;;  %v1492_v23 = vpack.c.bf16 %v391_v7, %v379_v59 }
  0x75   :  { %1673 = vmatpush1.bf16.msra.mxu0 %v2259_v4  ;;  %1483 = vmatprep.subr.bf16.mxu1 %v1482_v3  ;;  %v403_v22 = vand.u32 4294901760, %v402_v33  ;;  %v426_v14 = vsub.f32 %v2932_v30, %v425_v27  ;;  %v438_v10 = vsub.f32 %v2933_v34, %v437_v40  ;;  %v415_v25 = vand.u32 4294901760, %v414_v15 }
  0x76   :  { %1675 = vmatprep.subr.bf16.mxu0 %v2265_v12  ;;  %v2320_v49 = vpack.c.bf16 %v413_v29, %v401_v47  ;;  %v444_v4 = vsub.f32 %v2934_v45, %v443_v37  ;;  %v456_v1 = vsub.f32 %v2935_v38, %v455_v8  ;;  %v1494_v20 = vpack.c.bf16 %v409_v44, %v397_v51  ;;  %v2941_v44 = vld [vmem:[#allocation65_spill] sm:$0xff] }
  0x77   :  { %v450_v39 = vsub.f32 %v2936_v5, %v449_v19  ;;  %v462_v3 = vsub.f32 %v2937_v28, %v461_v9  ;;  %v473_v12 = vand.u32 4294901760, %v2940_v35  ;;  %v421_v59 = vand.u32 4294901760, %v420_v62 }
  0x78   :  { %1485 = vmatpush1.bf16.msra.mxu1 %v1484_v13  ;;  %v433_v7 = vand.u32 4294901760, %v432_v52  ;;  %v468_v33 = vsub.f32 %v2938_v48, %v467_v61  ;;  %v480_v47 = vsub.f32 %v2939_v55, %v479_v63  ;;  %v1690_v29 = vpack.c.bf16 %v431_v11, %v419_v26  ;;  %v2942_v48 = vld [vmem:[#allocation67_spill] sm:$0xff]  ;;  %v3000_v55 = vld [vmem:[#allocation80_spill] sm:$0xff] }
  0x79   :  { %1677 = vmatpush1.bf16.msra.mxu0 %v1676_v36  ;;  %1487 = vmatprep.subr.bf16.mxu1 %v1486_v50  ;;  %v427_v15 = vand.u32 4294901760, %v426_v14  ;;  %v439_v51 = vand.u32 4294901760, %v438_v10  ;;  %v485_v5 = vand.u32 4294901760, %v2941_v44  ;;  %v1496_v38 = vpack.c.bf16 %v415_v25, %v403_v22  ;;  %v2943_v50 = vld [vmem:[#allocation68_spill] sm:$0xff] }
  0x7a   :  { %1679 = vmatprep.subr.bf16.mxu0 %v2277_v46  ;;  %v2331_v28 = vpack.c.bf16 %v437_v40, %v425_v27  ;;  %v445_v45 = vand.u32 4294901760, %v444_v4  ;;  %v457_v13 = vand.u32 4294901760, %v456_v1  ;;  %v451_v36 = vand.u32 4294901760, %v450_v39 }
  0x7b   :  { %v463_v62 = vand.u32 4294901760, %v462_v3  ;;  %v474_v52 = vsub.f32 %v2940_v35, %v473_v12  ;;  %v491_v34 = vand.u32 4294901760, %v2942_v48  ;;  %v1498_v46 = vpack.c.bf16 %v433_v7, %v421_v59  ;;  %v2947_v59 = vld [vmem:[#allocation77_spill] sm:$0xff] }
  0x7c   :  { %1489 = vmatpush1.bf16.msra.mxu1 %v2289_v18  ;;  %v469_v14 = vand.u32 4294901760, %v468_v33  ;;  %v481_v10 = vand.u32 4294901760, %v480_v47  ;;  %v503_v26 = vand.u32 4294901760, %v2943_v50  ;;  %v1500_v1 = vpack.c.bf16 %v439_v51, %v427_v15  ;;  %v2948_v33 = vld [vmem:[#allocation79_spill] sm:$0xff]  ;;  %v2949_v15 = vld [vmem:[#allocation80_spill] sm:$0xff] }
  0x7d   :  { %1681 = vmatpush1.bf16.msra.mxu0 %v2283_v56  ;;  %1491 = vmatprep.subr.bf16.mxu1 %v2295_v17  ;;  %v1694_v39 = vpack.c.bf16 %v455_v8, %v443_v37  ;;  %v486_v11 = vsub.f32 %v2941_v44, %v485_v5  ;;  %v497_v27 = vand.u32 4294901760, %v2095_v21  ;;  %v1502_v40 = vpack.c.bf16 %v457_v13, %v445_v45  ;;  %v2944_v37 = vld [vmem:[#allocation73_spill] sm:$0xff] }
  0x7e   :  { %1683 = vmatprep.subr.bf16.mxu0 %v2285_v57  ;;  %v2342_v22 = vpack.c.bf16 %v461_v9, %v449_v19  ;;  %v2344_v18 = vpack.c.bf16 %v479_v63, %v467_v61  ;;  %v509_v56 = vand.u32 4294901760, %v2097_v41  ;;  %v2347_v25 = vpack.c.bf16 %v463_v62, %v451_v36  ;;  %v2945_v61 = vld [vmem:[#allocation74_spill] sm:$0xff]  ;;  %v2946_v9 = vld [vmem:[#allocation76_spill] sm:$0xff]  ;;  %v2951_v62 = vld [vmem:[#allocation83_spill] sm:$0xff] }
  0x7f   :  { %v475_v4 = vand.u32 4294901760, %v474_v52  ;;  %v2349_v3 = vpack.c.bf16 %v485_v5, %v473_v12  ;;  %v492_v57 = vsub.f32 %v2942_v48, %v491_v34  ;;  %v2353_v17 = vpack.c.bf16 %v481_v10, %v469_v14  ;;  %v2950_v36 = vld [vmem:[#allocation82_spill] sm:$0xff]  ;;  %v2952_v52 = vld [vmem:[#allocation85_spill] sm:$0xff] }
  0x80   :  { %1493 = vmatpush1.bf16.msra.mxu1 %v1492_v23  ;;  %v504_v45 = vsub.f32 %v2943_v50, %v503_v26  ;;  %v515_v8 = vand.u32 4294901760, %v2944_v37  ;;  %v527_v63 = vand.u32 4294901760, %v2945_v61  ;;  %v487_v19 = vand.u32 4294901760, %v486_v11  ;;  %v2953_v11 = vld [vmem:[#allocation87_spill] sm:$0xff] }
  0x81   :  { %1685 = vmatpush1.bf16.msra.mxu0 %v2297_v24  ;;  %1495 = vmatprep.subr.bf16.mxu1 %v1494_v20  ;;  %v498_v5 = vsub.f32 %v2095_v21, %v497_v27  ;;  %v521_v12 = vand.u32 4294901760, %v2946_v9  ;;  %v533_v23 = vand.u32 4294901760, %v2947_v59  ;;  %v2362_v7 = vpack.c.bf16 %v503_v26, %v491_v34 }
  0x82   :  { %1687 = vmatprep.subr.bf16.mxu0 %v2305_v16  ;;  %v510_v24 = vsub.f32 %v2097_v41, %v509_v56  ;;  %v539_v47 = vand.u32 4294901760, %v2948_v33  ;;  %v551_v51 = vand.u32 4294901760, %v2949_v15  ;;  %v493_v13 = vand.u32 4294901760, %v492_v57 }
  0x83   :  { %v545_v20 = vand.u32 4294901760, %v2950_v36  ;;  %v557_v16 = vand.u32 4294901760, %v2951_v62  ;;  %v563_v14 = vand.u32 4294901760, %v2952_v52  ;;  %v505_v10 = vand.u32 4294901760, %v504_v45 }
  0x84   :  { %1497 = vmatpush1.bf16.msra.mxu1 %v1496_v38  ;;  %v516_v34 = vsub.f32 %v2944_v37, %v515_v8  ;;  %v528_v26 = vsub.f32 %v2945_v61, %v527_v63  ;;  %v575_v41 = vand.u32 4294901760, %v2953_v11  ;;  %v1508_v21 = vpack.c.bf16 %v487_v19, %v475_v4 }
  0x85   :  { %1689 = vmatpush1.bf16.msra.mxu0 %v2320_v49  ;;  %1499 = vmatprep.subr.bf16.mxu1 %v1498_v46  ;;  %v499_v57 = vand.u32 4294901760, %v498_v5  ;;  %v522_v50 = vsub.f32 %v2946_v9, %v521_v12  ;;  %v534_v48 = vsub.f32 %v2947_v59, %v533_v23  ;;  %v511_v44 = vand.u32 4294901760, %v510_v24 }
  0x86   :  { %1691 = vmatprep.subr.bf16.mxu0 %v1690_v29  ;;  %v2376_v35 = vpack.c.bf16 %v509_v56, %v497_v27  ;;  %v540_v49 = vsub.f32 %v2948_v33, %v539_v47  ;;  %v552_v38 = vsub.f32 %v2949_v15, %v551_v51  ;;  %v546_v45 = vsub.f32 %v2950_v36, %v545_v20  ;;  %v2954_v27 = vld [vmem:[#allocation89_spill] sm:$0xff]  ;;  %v2955_v36 = vld [vmem:[#allocation92_spill] sm:$0xff] }
  0x87   :  { %v558_v61 = vsub.f32 %v2951_v62, %v557_v16  ;;  %v564_v46 = vsub.f32 %v2952_v52, %v563_v14  ;;  %v576_v29 = vsub.f32 %v2953_v11, %v575_v41  ;;  %v1510_v4 = vpack.c.bf16 %v505_v10, %v493_v13 }
  0x88   :  { %1501 = vmatpush1.bf16.msra.mxu1 %v1500_v1  ;;  %v517_v19 = vand.u32 4294901760, %v516_v34  ;;  %v529_v5 = vand.u32 4294901760, %v528_v26  ;;  %v2828_v56 = vand.u32 4294901760, %v2954_v27  ;;  %v1706_v24 = vpack.c.bf16 %v527_v63, %v515_v8 }
  0x89   :  { %1693 = vmatpush1.bf16.msra.mxu0 %v2331_v28  ;;  %1503 = vmatprep.subr.bf16.mxu1 %v1502_v40  ;;  %v523_v15 = vand.u32 4294901760, %v522_v50  ;;  %v535_v33 = vand.u32 4294901760, %v534_v48  ;;  %v2827_v59 = vand.u32 4294901760, %v2955_v36  ;;  %v1512_v62 = vpack.c.bf16 %v511_v44, %v499_v57  ;;  %v2956_v44 = vld [vmem:[#allocation93_spill] sm:$0xff] }
  0x8a   :  { %1695 = vmatprep.subr.bf16.mxu0 %v1694_v39  ;;  %v2387_v9 = vpack.c.bf16 %v533_v23, %v521_v12  ;;  %v541_v52 = vand.u32 4294901760, %v540_v49  ;;  %v553_v11 = vand.u32 4294901760, %v552_v38  ;;  %v547_v1 = vand.u32 4294901760, %v546_v45 }
  0x8b   :  { %v559_v37 = vand.u32 4294901760, %v558_v61  ;;  %v565_v28 = vand.u32 4294901760, %v564_v46  ;;  %v577_v13 = vand.u32 4294901760, %v576_v29  ;;  %v1514_v40 = vpack.c.bf16 %v529_v5, %v517_v19  ;;  %v2964_v46 = vld [vmem:[#allocation26_spill] sm:$0xff]  ;;  %v2965_v29 = vld [vmem:[#allocation27_spill] sm:$0xff]  ;;  %v2966_v5 = vld [vmem:[#allocation28_spill] sm:$0xff] }
  0x8c   :  { %1505 = vmatpush1.bf16.msra.mxu1 %v2347_v25  ;;  %v2391_v39 = vpack.c.bf16 %v551_v51, %v539_v47  ;;  %v2396_v48 = vsub.f32 %v2954_v27, %v2828_v56  ;;  %v2826_v50 = vand.u32 4294901760, %v2956_v44  ;;  %v1516_v8 = vpack.c.bf16 %v535_v33, %v523_v15  ;;  %v2958_v33 = vld [vmem:[#allocation18_spill] sm:$0xff]  ;;  %v2959_v15 = vld [vmem:[#allocation19_spill] sm:$0xff] }
  0x8d   :  { %1697 = vmatpush1.bf16.msra.mxu0 %v2342_v22  ;;  %1507 = vmatprep.subr.bf16.mxu1 %v2353_v17  ;;  %v2404_v25 = vsub.f32 %v2955_v36, %v2827_v59  ;;  %v2957_v22 = vld [vmem:[#allocation95_spill] sm:$0xff]  ;;  %v2824_v63 = vand.u32 4294901760, %v2172_v58  ;;  %v1518_v12 = vpack.c.bf16 %v553_v11, %v541_v52  ;;  %v2408_v23 = vpack.c.bf16 %v557_v16, %v545_v20  ;;  %v2960_v20 = vld [vmem:[#allocation20_spill] sm:$0xff]  ;;  %v2961_v16 = vld [vmem:[#allocation21_spill] sm:$0xff] }
  0x8e   :  { %1699 = vmatprep.subr.bf16.mxu0 %v2344_v18  ;;  %v2825_v61 = vand.u32 4294901760, %v2957_v22  ;;  %v2410_v47 = vpack.c.bf16 %v575_v41, %v563_v14  ;;  %v2823_v51 = vand.u32 4294901760, %v2174_v43  ;;  %v1520_v17 = vpack.c.bf16 %v559_v37, %v547_v1  ;;  %v2962_v52 = vld [vmem:[#allocation22_spill] sm:$0xff]  ;;  %v2963_v14 = vld [vmem:[#allocation23_spill] sm:$0xff]  ;;  %v2988_v11 = vld [vmem:[#allocation64_spill] sm:$0xff] }
  0x8f   :  { %v2413_v10 = vpack.c.bf16 %v577_v13, %v565_v28  ;;  %v2822_v18 = vand.u32 4294901760, %v2181_v0  ;;  %v571_v26 = vand.u32 4294901760, %v2396_v48  ;;  %v2423_v41 = vsub.f32 %v2956_v44, %v2826_v50  ;;  %v2967_v28 = vld [vmem:[#allocation29_spill] sm:$0xff]  ;;  %v2968_v13 = vld [vmem:[#allocation30_spill] sm:$0xff]  ;;  %v2999_v37 = vld [vmem:[#allocation79_spill] sm:$0xff] }
  0x90   :  { %1509 = vmatpush1.bf16.msra.mxu1 %v1508_v21  ;;  %v583_v21 = vand.u32 4294901760, %v2404_v25  ;;  %v2437_v57 = vsub.f32 %v2172_v58, %v2824_v63  ;;  %v2831_v49 = vand.u32 4294901760, %v2194_v42  ;;  %v606_v38 = vsub.f32 %v2174_v43, %v2823_v51  ;;  %v2994_v1 = vld [vmem:[#allocation101_spill] sm:$0xff]  ;;  %v2997_v63 = vld [vmem:[#allocation76_spill] sm:$0xff]  ;;  %v3002_v56 = vld [vmem:[#allocation83_spill] sm:$0xff] }
  0x91   :  { %1701 = vmatpush1.bf16.msra.mxu0 %v2349_v3  ;;  %1511 = vmatprep.subr.bf16.mxu1 %v1510_v4  ;;  %v600_v3 = vsub.f32 %v2957_v22, %v2825_v61  ;;  %v2452_v19 = vsub.f32 %v2181_v0, %v2822_v18  ;;  %v589_v45 = vand.u32 4294901760, %v2423_v41  ;;  %v2981_v4 = vld [vmem:[#allocation50_spill] sm:$0xff]  ;;  %v2989_v41 = vld [vmem:[#allocation65_spill] sm:$0xff]  ;;  %v629_v51 = vand.u32 4294901760, %v2994_v1 }
  0x92   :  { %1703 = vmatprep.subr.bf16.mxu0 %v2362_v7  ;;  %v624_v7 = vsub.f32 %v2194_v42, %v2831_v49  ;;  %v3001_v61 = vld [vmem:[#allocation82_spill] sm:$0xff]  ;;  %v3006_v18 = vand.u32 4294901760, %v2955_v36  ;;  %v595_v49 = vand.u32 4294901760, %v2437_v57  ;;  %v607_v34 = vand.u32 4294901760, %v606_v38 }
  0x93   :  { %v601_v50 = vand.u32 4294901760, %v600_v3  ;;  %v1524_v3 = vpack.c.bf16 %v583_v21, %v571_v26  ;;  %v630_v59 = vsub.f32 %v2994_v1, %v629_v51  ;;  %v3007_v21 = vand.u32 4294901760, %v2956_v44 }
  0x94   :  { %1513 = vmatpush1.bf16.msra.mxu1 %v1512_v62  ;;  %v2975_v62 = vld [vmem:[#allocation99_spill] sm:$0xff]  ;;  %v1528_v57 = vpack.c.bf16 %v607_v34, %v595_v49  ;;  %v3009_v38 = vand.u32 4294901760, %v2172_v58  ;;  %v3013_v34 = vpack.c.bf16 %v2959_v15, %v2958_v33  ;;  %v3015_v49 = vld [vmem:[#allocation88_spill] sm:$0xff]  ;;  %v3020_v33 = vld [vmem:[#allocation90_spill] sm:$0xff] }
  0x95   :  { %1705 = vmatpush1.bf16.msra.mxu0 %v2376_v35  ;;  %1515 = vmatprep.subr.bf16.mxu1 %v1514_v40  ;;  %v617_v48 = vand.u32 4294901760, %v2975_v62  ;;  %v2995_v40 = vld [vmem:[#allocation73_spill] sm:$0xff]  ;;  %v1526_v26 = vpack.c.bf16 %v601_v50, %v589_v45  ;;  %v3012_v45 = vand.u32 4294901760, %v2194_v42  ;;  %v3021_v15 = vld [vmem:[#allocation86_spill] sm:$0xff] }
  0x96   :  { %1707 = vmatprep.subr.bf16.mxu0 %v1706_v24  ;;  %v2996_v24 = vld [vmem:[#allocation74_spill] sm:$0xff] }
  0x97   :  { %v618_v25 = vsub.f32 %v2975_v62, %v617_v48  ;;  %v631_v62 = vand.u32 4294901760, %v630_v59  ;;  %v3014_v59 = vld [vmem:[#allocation11_spill] sm:$0xff] }
  0x98   :  { %1517 = vmatpush1.bf16.msra.mxu1 %v1516_v8  ;;  %v3005_v8 = vand.u32 4294901760, %v2954_v27 }
  0x99   :  { %1709 = vmatpush1.bf16.msra.mxu0 %v2387_v9  ;;  %1519 = vmatprep.subr.bf16.mxu1 %v1518_v12  ;;  %v3004_v9 = vld [vmem:[#allocation87_spill] sm:$0xff] }
  0x9a   :  { %1711 = vmatprep.subr.bf16.mxu0 %v2391_v39  ;;  %v1716_v35 = vpack.c.bf16 %v3006_v18, %v3005_v8  ;;  %v3008_v39 = vand.u32 4294901760, %v2957_v22  ;;  %v3010_v8 = vand.u32 4294901760, %v2174_v43 }
  0x9c   :  { %1521 = vmatpush1.bf16.msra.mxu1 %v1520_v17  ;;  %v1718_v18 = vpack.c.bf16 %v3008_v39, %v3007_v21  ;;  %v613_v17 = vand.u32 4294901760, %v2452_v19  ;;  %v1720_v12 = vpack.c.bf16 %v3010_v8, %v3009_v38  ;;  %v1724_v19 = vpack.c.bf16 %v629_v51, %v617_v48  ;;  %v3019_v48 = vld [vmem:[#allocation13_spill] sm:$0xff]  ;;  %v3045_v38 = vld [vmem:[#allocation40_spill] sm:$0xff] }
  0x9d   :  { %1713 = vmatpush1.bf16.msra.mxu0 %v2408_v23  ;;  %1523 = vmatprep.subr.bf16.mxu1 %v2413_v10  ;;  %v625_v23 = vand.u32 4294901760, %v624_v7  ;;  %v619_v10 = vand.u32 4294901760, %v618_v25  ;;  %v3016_v25 = vpack.c.bf16 %v2961_v16, %v2960_v20  ;;  %v3018_v51 = vpack.c.bf16 %v2963_v14, %v2962_v52  ;;  %v3025_v16 = vld [vmem:[#allocation15_spill] sm:$0xff]  ;;  %v3027_v14 = vld [vmem:[#allocation16_spill] sm:$0xff] }
  0x9e   :  { %1715 = vmatprep.subr.bf16.mxu0 %v2410_v47  ;;  %v3011_v47 = vand.u32 4294901760, %v2181_v0  ;;  %v3024_v20 = vpack.c.bf16 %v1981_v2, %v1974_v60  ;;  %v3026_v52 = vpack.c.bf16 %v2965_v29, %v2964_v46  ;;  %v3031_v60 = vld [vmem:[#allocation24_spill] sm:$0xff]  ;;  %v3032_v2 = vld [vmem:[#allocation33_spill] sm:$0xff] }
  0x9f   :  { %v1530_v50 = vpack.c.bf16 %v625_v23, %v613_v17  ;;  %v1532_v7 = vpack.c.bf16 %v631_v62, %v619_v10  ;;  %v3017_v62 = vld [vmem:[#allocation12_spill] sm:$0xff]  ;;  %v3035_v46 = vld [vmem:[#allocation25_spill] sm:$0xff]  ;;  %v3047_v10 = vld [vmem:[#allocation39_spill] sm:$0xff] }
  0xa0   :  { %1525 = vmatpush1.bf16.msra.mxu1 %v1524_v3  ;;  %v1722_v39 = vpack.c.bf16 %v3012_v45, %v3011_v47  ;;  %v3028_v3 = vpack.c.bf16 %v1991_v6, %v2966_v5  ;;  %v3036_v29 = vld [vmem:[#allocation36_spill] sm:$0xff]  ;;  %v3039_v6 = vld [vmem:[#allocation31_spill] sm:$0xff]  ;;  %v3040_v5 = vld [vmem:[#allocation38_spill] sm:$0xff] }
  0xa1   :  { %1717 = vmatpush1.bf16.msra.mxu0 %v1716_v35  ;;  %1527 = vmatprep.subr.bf16.mxu1 %v1526_v26  ;;  %v3022_v35 = vpack.c.bf16 %v1968_v54, %v1966_v53  ;;  %v3029_v53 = vld [vmem:[#allocation17_spill] sm:$0xff]  ;;  %v3030_v54 = vpack.c.bf16 %v2968_v13, %v2967_v28  ;;  %v3033_v26 = vld [vmem:[#allocation32_spill] sm:$0xff]  ;;  %v3043_v28 = vld [vmem:[#allocation34_spill] sm:$0xff] }
  0xa2   :  { %1719 = vmatprep.subr.bf16.mxu0 %v1718_v18  ;;  %v3034_v21 = vpack.c.bf16 %v3032_v2, %v3033_v26  ;;  %v3037_v18 = vld [vmem:[#allocation35_spill] sm:$0xff]  ;;  %v3041_v23 = vld [vmem:[#allocation37_spill] sm:$0xff]  ;;  %v3075_v2 = vld [vmem:[#allocation68_spill] sm:$0xff] }
  0xa3   :  { %v3038_v17 = vpack.c.bf16 %v3036_v29, %v3037_v18  ;;  %v3044_v13 = vld [vmem:[#allocation41_spill] sm:$0xff]  ;;  %v3049_v47 = vld [vmem:[#allocation43_spill] sm:$0xff]  ;;  %v3080_v18 = vld [vmem:[#allocation70_spill] sm:$0xff] }
  0xa4   :  { %1529 = vmatpush1.bf16.msra.mxu1 %v1528_v57  ;;  %v3042_v57 = vpack.c.bf16 %v3040_v5, %v3041_v23  ;;  %v3046_v8 = vpack.c.bf16 %v3044_v13, %v3045_v38  ;;  %v3076_v26 = vld [vmem:[#allocation67_spill] sm:$0xff]  ;;  %v3083_v5 = vpack.c.bf16 %v2996_v24, %v2995_v40  ;;  %v3089_v13 = vpack.c.bf16 %v3002_v56, %v3001_v61  ;;  %v3090_v40 = vld [vmem:[#allocation81_spill] sm:$0xff]  ;;  %v3097_v56 = vld [vmem:[#allocation94_spill] sm:$0xff] }
  0xa5   :  { %1721 = vmatpush1.bf16.msra.mxu0 %v1720_v12  ;;  %1531 = vmatprep.subr.bf16.mxu1 %v1530_v50  ;;  %v3023_v12 = vld [vmem:[#allocation14_spill] sm:$0xff]  ;;  %v3048_v50 = vld [vmem:[#allocation44_spill] sm:$0xff]  ;;  %v3079_v29 = vld [vmem:[#allocation71_spill] sm:$0xff]  ;;  %v3098_v61 = vpack.c.bf16 %v2174_v43, %v2172_v58 }
  0xa6   :  { %1723 = vmatprep.subr.bf16.mxu0 %v1722_v39  ;;  %v3050_v45 = vpack.c.bf16 %v3048_v50, %v3049_v47  ;;  %v3051_v39 = vld [vmem:[#allocation42_spill] sm:$0xff]  ;;  %v3086_v23 = vld [vmem:[#allocation75_spill] sm:$0xff]  ;;  %v3091_v24 = vld [vmem:[#allocation85_spill] sm:$0xff] }
  0xa7   :  { %v3092_v38 = vpack.c.bf16 %v3004_v9, %v3091_v24  ;;  %v3099_v9 = vld [vmem:[#allocation97_spill] sm:$0xff] }
  0xa8   :  { %1533 = vmatpush1.bf16.msra.mxu1 %v1532_v7  ;;  %v3052_v7 = vld [vmem:[#allocation47_spill] sm:$0xff] }
  0xa9   :  { %1725 = vmatpush1.bf16.msra.mxu0 %v1724_v19  ;;  %1535 = vmatprep.subr.bf16.mxu1 %v3013_v34  ;;  %v3053_v19 = vld [vmem:[#allocation46_spill] sm:$0xff] }
  0xaa   :  { %1727 = vmatprep.subr.bf16.mxu0 %v3014_v59  ;;  %v3054_v34 = vpack.c.bf16 %v3052_v7, %v3053_v19  ;;  %v3055_v59 = vld [vmem:[#allocation45_spill] sm:$0xff] }
  0xab   :  { %636 = vmatmul.mubr.f32.vlgmr.msra.gmra.mrb[0].mxu1 %v3015_v49 }
  0xac   :  { %1245 = vmatmul.mubr.f32.vlgmr.msra.gmra.mrb[0].mxu0 %v3015_v49  ;;  %1537 = vmatpush1.bf16.msra.mxu1 %v3016_v25  ;;  %v3056_v25 = vld [vmem:[#allocation48_spill] sm:$0xff] }
  0xad   :  { %1729 = vmatpush1.bf16.msra.mxu0 %v3017_v62  ;;  %1539 = vmatprep.subr.bf16.mxu1 %v3018_v51  ;;  %v3057_v62 = vpack.c.bf16 %v2981_v4, %v3056_v25  ;;  %v3058_v51 = vld [vmem:[#allocation49_spill] sm:$0xff] }
  0xae   :  { %1731 = vmatprep.subr.bf16.mxu0 %v3019_v48  ;;  %836 = vmatprep.mubr.f32.mxu1 %v3020_v33  ;;  %v3059_v48 = vpack.c.bf16 %v2982_v31, %v2932_v30  ;;  %v3060_v33 = vld [vmem:[#allocation51_spill] sm:$0xff]  ;;  %v3068_v4 = vld [vmem:[#allocation57_spill] sm:$0xff]  ;;  %v3072_v31 = vld [vmem:[#allocation60_spill] sm:$0xff]  ;;  %v3073_v30 = vpack.c.bf16 %v2989_v41, %v2988_v11  ;;  %v3085_v41 = vpack.c.bf16 %v2998_v32, %v2997_v63 }
  0xaf   :  { %1380 = vmatprep.mubr.f32.mxu0 %v3021_v15  ;;  %v3061_v15 = vld [vmem:[#allocation56_spill] sm:$0xff]  ;;  %v3094_v63 = vpack.c.bf16 %v2955_v36, %v2954_v27  ;;  %v3101_v36 = vld [vmem:[#allocation98_spill] sm:$0xff]  ;;  %v3102_v27 = vld [vmem:[#allocation99_spill] sm:$0xff] }
  0xb0   :  { %1541 = vmatpush1.bf16.msra.mxu1 %v3022_v35  ;;  %v3062_v35 = vld [vmem:[#allocation55_spill] sm:$0xff]  ;;  %v3084_v11 = vld [vmem:[#allocation72_spill] sm:$0xff] }
  0xb1   :  { %1733 = vmatpush1.bf16.msra.mxu0 %v3023_v12  ;;  %1543 = vmatprep.subr.bf16.mxu1 %v3024_v20  ;;  %v3063_v12 = vpack.c.bf16 %v3061_v15, %v3062_v35  ;;  %v3064_v20 = vld [vmem:[#allocation54_spill] sm:$0xff]  ;;  %v3093_v32 = vld [vmem:[#allocation84_spill] sm:$0xff] }
  0xb2   :  { %1735 = vmatprep.subr.bf16.mxu0 %v3025_v16  ;;  %v3065_v16 = vld [vmem:[#allocation59_spill] sm:$0xff] }
  0xb4   :  { %1545 = vmatpush1.bf16.msra.mxu1 %v3026_v52  ;;  %v3066_v52 = vld [vmem:[#allocation58_spill] sm:$0xff] }
  0xb5   :  { %1737 = vmatpush1.bf16.msra.mxu0 %v3027_v14  ;;  %1547 = vmatprep.subr.bf16.mxu1 %v3028_v3  ;;  %v3067_v14 = vpack.c.bf16 %v3065_v16, %v3066_v52  ;;  %v3069_v3 = vld [vmem:[#allocation62_spill] sm:$0xff] }
  0xb6   :  { %1739 = vmatprep.subr.bf16.mxu0 %v3029_v53  ;;  %v3070_v53 = vld [vmem:[#allocation61_spill] sm:$0xff] }
  0xb8   :  { %1549 = vmatpush1.bf16.msra.mxu1 %v3030_v54  ;;  %v3071_v54 = vpack.c.bf16 %v3069_v3, %v3070_v53 }
  0xb9   :  { %1741 = vmatpush1.bf16.msra.mxu0 %v3031_v60  ;;  %1551 = vmatprep.subr.bf16.mxu1 %v3034_v21  ;;  %v3074_v60 = vld [vmem:[#allocation63_spill] sm:$0xff]  ;;  %v3077_v21 = vpack.c.bf16 %v3075_v2, %v3076_v26 }
  0xba   :  { %1743 = vmatprep.subr.bf16.mxu0 %v3035_v46  ;;  %v3078_v46 = vld [vmem:[#allocation66_spill] sm:$0xff] }
  0xbc   :  { %1553 = vmatpush1.bf16.msra.mxu1 %v3038_v17  ;;  %v3081_v17 = vpack.c.bf16 %v3079_v29, %v3080_v18 }
  0xbd   :  { %1745 = vmatpush1.bf16.msra.mxu0 %v3039_v6  ;;  %1555 = vmatprep.subr.bf16.mxu1 %v3042_v57  ;;  %v3082_v6 = vld [vmem:[#allocation69_spill] sm:$0xff]  ;;  %v3087_v57 = vpack.c.bf16 %v3000_v55, %v2999_v37  ;;  %v3095_v55 = vld [vmem:[#allocation91_spill] sm:$0xff]  ;;  %v3096_v37 = vpack.c.bf16 %v2957_v22, %v2956_v44  ;;  %v3104_v44 = vld [vmem:[#allocation100_spill] sm:$0xff] }
  0xbe   :  { %1747 = vmatprep.subr.bf16.mxu0 %v3043_v28  ;;  %v3088_v28 = vld [vmem:[#allocation78_spill] sm:$0xff]  ;;  %v3105_v22 = vld [vmem:[#allocation96_spill] sm:$0xff] }
  0xc0   :  { %1557 = vmatpush1.bf16.msra.mxu1 %v3046_v8  ;;  %v3100_v8 = vpack.c.bf16 %v2194_v42, %v2181_v0 }
  0xc1   :  { %1749 = vmatpush1.bf16.msra.mxu0 %v3047_v10  ;;  %1559 = vmatprep.subr.bf16.mxu1 %v3050_v45  ;;  %v3103_v10 = vpack.c.bf16 %v2994_v1, %v3102_v27 }
  0xc2   :  { %1751 = vmatprep.subr.bf16.mxu0 %v3051_v39 }
  0xc4   :  { %1561 = vmatpush1.bf16.msra.mxu1 %v3054_v34 }
  0xc5   :  { %1753 = vmatpush1.bf16.msra.mxu0 %v3055_v59  ;;  %1563 = vmatprep.subr.bf16.mxu1 %v3057_v62 }
  0xc6   :  { %1755 = vmatprep.subr.bf16.mxu0 %v3058_v51 }
  0xc8   :  { %1565 = vmatpush1.bf16.msra.mxu1 %v3059_v48 }
  0xc9   :  { %1757 = vmatpush1.bf16.msra.mxu0 %v3060_v33  ;;  %1567 = vmatprep.subr.bf16.mxu1 %v3063_v12 }
  0xca   :  { %1759 = vmatprep.subr.bf16.mxu0 %v3064_v20 }
  0xcc   :  { %1569 = vmatpush1.bf16.msra.mxu1 %v3067_v14 }
  0xcd   :  { %1761 = vmatpush1.bf16.msra.mxu0 %v3068_v4  ;;  %1571 = vmatprep.subr.bf16.mxu1 %v3071_v54 }
  0xce   :  { %1763 = vmatprep.subr.bf16.mxu0 %v3072_v31 }
  0xd0   :  { %1573 = vmatpush1.bf16.msra.mxu1 %v3073_v30 }
  0xd1   :  { %1765 = vmatpush1.bf16.msra.mxu0 %v3074_v60  ;;  %1575 = vmatprep.subr.bf16.mxu1 %v3077_v21 }
  0xd2   :  { %1767 = vmatprep.subr.bf16.mxu0 %v3078_v46 }
  0xd4   :  { %1577 = vmatpush1.bf16.msra.mxu1 %v3081_v17 }
  0xd5   :  { %1769 = vmatpush1.bf16.msra.mxu0 %v3082_v6  ;;  %1579 = vmatprep.subr.bf16.mxu1 %v3083_v5 }
  0xd6   :  { %1771 = vmatprep.subr.bf16.mxu0 %v3084_v11 }
  0xd8   :  { %1581 = vmatpush1.bf16.msra.mxu1 %v3085_v41 }
  0xd9   :  { %1773 = vmatpush1.bf16.msra.mxu0 %v3086_v23  ;;  %1583 = vmatprep.subr.bf16.mxu1 %v3087_v57 }
  0xda   :  { %1775 = vmatprep.subr.bf16.mxu0 %v3088_v28 }
  0xdc   :  { %1585 = vmatpush1.bf16.msra.mxu1 %v3089_v13 }
  0xdd   :  { %1777 = vmatpush1.bf16.msra.mxu0 %v3090_v40  ;;  %1587 = vmatprep.subr.bf16.mxu1 %v3092_v38 }
  0xde   :  { %1779 = vmatprep.subr.bf16.mxu0 %v3093_v32 }
  0xe0   :  { %1589 = vmatpush1.bf16.msra.mxu1 %v3094_v63 }
  0xe1   :  { %1781 = vmatpush1.bf16.msra.mxu0 %v3095_v55  ;;  %1591 = vmatprep.subr.bf16.mxu1 %v3096_v37 }
  0xe2   :  { %1783 = vmatprep.subr.bf16.mxu0 %v3097_v56 }
  0xe4   :  { %1593 = vmatpush1.bf16.msra.mxu1 %v3098_v61 }
  0xe5   :  { %1785 = vmatpush1.bf16.msra.mxu0 %v3099_v9  ;;  %1595 = vmatprep.subr.bf16.mxu1 %v3100_v8 }
  0xe6   :  { %1787 = vmatprep.subr.bf16.mxu0 %v3101_v36 }
  0xe8   :  { %1597 = vmatpush1.bf16.msra.mxu1 %v3103_v10 }
  0xe9   :  { %1789 = vmatpush1.bf16.msra.mxu0 %v3104_v44 }
  0xeb   :  { %839 = vmatmul.mubr.f32.vlgmr.msra.gmra.mrb[0].mxu1 %v3105_v22 }
  0xec   :  { %1382 = vmatmul.mubr.f32.vlgmr.msra.gmra.mrb[0].mxu0 %v3015_v49 }
 0x1be   :  { %v840_v58 = vpop.f32.mrb[0].mxu1 }
 0x1bf   :  { %v1383_v43 = vpop.f32.mrb[0].mxu0  ;;  %v842_v47 = vpop.f32.mrb[1].mxu1 }
 0x1c0   :  { %v1790_v50 = vadd.f32 %v1383_v43, %v840_v58  ;;  %v1385_v0 = vpop.f32.mrb[1].mxu0 }
 0x1c1   :  { %v1791_v42 = vadd.f32 %v1385_v0, %v842_v47 }
 0x1c2   :  { %1388 = vst [vmem:[#allocation7] sm:$0xff] %v1790_v50 }
 0x1c3   :  { %1389 = vst [vmem:[#allocation7 + $0x8] sm:$0xff] %v1791_v42 }
 0x1c4   :  { %1860 = shalt.err (!%p1857_p6)
}
 0x1c5   :  { %s1861_s10 = scalar_lea.hbm %s2686_s2, 256 }
 0x1c6   :  { %p1862_p7 = scmp.ne.s32.totalorder %s2686_s2, %s1861_s10  ;;  %p1865_p8 = scmp.lt.u32.totalorder %s1861_s10, %s2686_s2 }
 0x1c8   :  { %p1867_p9 = pnand %p1865_p8, %p1862_p7 }
 0x1ca   :  { %1870 = shalt.err (!%p1867_p9)
}
 0x1cb   :  { %1399 = dma.vmem_to_hbm [thread:$0]  %s1397_s6, 256, %s2686_s2, [#allocation4]  }
 0x1cc   :  { %1875 = dma.done.wait [#allocation4], 256  }
 0x1cd   :  { %1876 = vsyncadd [#allocation4], 4294967040 }
 0x1ce   :  { %1403 = vsyncpa [#allocation3], 1 }
 0x1cf   :  { %1404 = vsyncpa [#allocation6], 1 }
 0x1d0   :  { %1405 = vsyncpa [#allocation4], 1 }

</bundles_post_ra>
